<compile_context>
chip_gen: v7x
topology: tpu7x:2x2x1
jax: 0.10.0
libtpu: 0.0.40
codegen_flags: <defaults>
</compile_context>

<pallas_src>
import numpy as np
import jax
import jax.numpy as jnp
from jax import lax
from jax.experimental import pallas as pl
from jax.experimental.pallas import tpu as pltpu

# ----- static shapes implied by the module (fc1 = Linear(8*2, domains)) -----
N = 2             # batch
L = 58            # input length; chosen so pool3 output length == 2 (=> 8*2 features)
C1, C2, C3 = 32, 16, 8
K1, K2, K3 = 5, 5, 2
DOMAINS = 4

T1 = L - (K1 - 1)            # 54  conv1 out (stride 1)
P1 = (T1 - 2) // 2 + 1       # 27  pool1 out (k=2, s=2)
T2 = (P1 - K2) // 2 + 1      # 12  conv2 out (k=5, s=2)
P2 = (T2 - 2) // 2 + 1       # 6   pool2 out (k=2, s=2)
T3 = (P2 - K3) // 2 + 1      # 3   conv3 out (k=2, s=2)
P3 = T3 - 1                  # 2   pool3 out (k=2, s=1)
assert C3 * P3 == 16         # matches fc1 input features
assert T1 == 2 * P1 and T2 == 2 * P2 and P2 == 2 * T3 and T2 == 4 * T3

# ---- packed parameter slab layout (SLAB_ROWS x 32 lanes, f32), 8-row aligned blocks ----
W1_OFF = 0                    # rows 0:5          w1  (K1, C1)
W2_OFF = 8                    # rows 8:168        w2  K2 blocks of (C1, C2)
W3_OFF = W2_OFF + K2 * C1     # 168: rows 168:200 w3  K3 blocks of (C2, C3)
WF_OFF = W3_OFF + K3 * C2     # 200: rows 200:216 fc1 P3 blocks of (C3, DOMAINS)
B_OFF = WF_OFF + P3 * C3      # 216: rows 216:220 biases b1/b2/b3/bf (one per row)
SLAB_ROWS = 224
SLAB_COLS = C1                # 32

# conv2 tap j reads pooled position 2*t+j; with p1's per-sample rows ordered
# [even positions (14) | odd positions (13)] every tap is a contiguous 12-row slice.
CONV2_TAP_OFFSETS = (0, 14, 1, 15, 2)

# Host-side im2col row permutation: rows 0:54 ("block A") pair with rows 54:108
# ("block B") for pool1, and the pooled result comes out even-positions-first per sample.
_half_t = np.concatenate([np.arange(0, T1, 4), np.arange(2, T1, 4)])      # (27,)
_n_idx = np.tile(np.repeat(np.arange(N), P1), 2)                          # (108,)
_t_idx = np.concatenate([np.tile(_half_t, N), np.tile(_half_t, N) + 1])   # (108,)
_k_idx = np.arange(K1)                                                    # (5,)


def _elu(v):
    # F.elu, alpha=1.0 (clamp exp argument so the unselected branch stays finite)
    return jnp.where(v > 0, v, jnp.exp(jnp.minimum(v, 0.0)) - 1.0)


# ----------------------------- Pallas kernels --------------------------------
def domain_cnn_kernel(xw_ref, w_ref, out_ref):
    # parameter views: static slices of the single packed slab
    w1 = w_ref[W1_OFF:W1_OFF + K1, 0:C1]                                   # (5, 32)
    w2 = [w_ref[W2_OFF + C1 * j: W2_OFF + C1 * (j + 1), 0:C2] for j in range(K2)]
    w3 = [w_ref[W3_OFF + C2 * j: W3_OFF + C2 * (j + 1), 0:C3] for j in range(K3)]
    wf = [w_ref[WF_OFF + C3 * p: WF_OFF + C3 * (p + 1), 0:DOMAINS] for p in range(P3)]
    bias = w_ref[B_OFF:B_OFF + 4, 0:C1]                                    # (4, 32)
    b1, b2 = bias[0:1, 0:C1], bias[1:2, 0:C2]
    b3, bf = bias[2:3, 0:C3], bias[3:4, 0:DOMAINS]

    # conv1 + ELU: one MXU dot over the K1=5 host-built (row-permuted) im2col.
    h1 = _elu(jnp.dot(xw_ref[...], w1, preferred_element_type=jnp.float32) + b1)  # (108, 32)

    # pool1 (k=2, s=2): pooling partners live in the two halves -> single max of
    # two contiguous value slices (no scratch, no strided access).
    p1 = jnp.maximum(h1[0:N * P1], h1[N * P1:2 * N * P1])                   # (54, 32)

    logit_rows = []
    for n in range(N):
        base = n * P1
        # conv2 (k=5, s=2) + ELU: per-tap MXU accumulate; taps are contiguous slices.
        h2 = b2
        for j, off in enumerate(CONV2_TAP_OFFSETS):
            tap = p1[base + off: base + off + T2]                           # (12, 32)
            h2 = h2 + jnp.dot(tap, w2[j], preferred_element_type=jnp.float32)
        h2 = _elu(h2)                                                       # (12, 16)

        # pool2 (k=2,s=2) + conv3 (k=2,s=2) + ELU: each conv3 output consumes 4
        # consecutive h2 rows, so everything stays unit-stride.
        h3 = []
        for t in range(T3):
            blk = h2[4 * t: 4 * t + 4]                                      # (4, 16)
            a = jnp.maximum(blk[0:1], blk[1:2])                             # pooled pos 2t
            c = jnp.maximum(blk[2:3], blk[3:4])                             # pooled pos 2t+1
            h3.append(_elu(b3
                           + jnp.dot(a, w3[0], preferred_element_type=jnp.float32)
                           + jnp.dot(c, w3[1], preferred_element_type=jnp.float32)))  # (1, 8)

        # pool3 (k=2, s=1) + fc1 (per pooled position; weights pre-split on host).
        m0 = jnp.maximum(h3[0], h3[1])                                      # (1, 8)
        m1 = jnp.maximum(h3[1], h3[2])
        logit_rows.append(bf
                          + jnp.dot(m0, wf[0], preferred_element_type=jnp.float32)
                          + jnp.dot(m1, wf[1], preferred_element_type=jnp.float32))   # (1, 4)

    logits = jnp.concatenate(logit_rows, axis=0)                            # (2, 4)
    # softmax(dim=1)
    mx = jnp.max(logits, axis=-1, keepdims=True)
    e = jnp.exp(logits - mx)
    out_ref[...] = e / jnp.sum(e, axis=-1, keepdims=True)


def domain_loss_kernel(logits_ref, tgt_ref, loss_ref):
    z = logits_ref[...]                                                     # (N, K) f32
    t = tgt_ref[...]                                                        # (N, 1) int32
    cls = lax.broadcasted_iota(jnp.int32, z.shape, 1)                       # (N, K)
    mx = jnp.max(z, axis=-1, keepdims=True)
    lse = mx + jnp.log(jnp.sum(jnp.exp(z - mx), axis=-1, keepdims=True))    # (N, 1)
    picked = jnp.sum(jnp.where(cls == t, z, 0.0), axis=-1, keepdims=True)   # (N, 1)
    ce = lse - picked                                                       # per-sample CE
    # TODO(synk): spec's `loss.sum / loss.shape[1]` is not executable; use batch mean
    # (PyTorch CrossEntropyLoss default reduction).
    loss_ref[...] = jnp.sum(ce, axis=0, keepdims=True) * (1.0 / z.shape[0])


# ------------------------------ host wrappers ---------------------------------
def prepare_params(params):
    """One-time repack of PyTorch-layout params into a single (224, 32) f32 slab."""
    w1, b1, w2, b2, w3, b3, wfc, bfc = params
    slab = jnp.zeros((SLAB_ROWS, SLAB_COLS), jnp.float32)
    slab = slab.at[W1_OFF:W1_OFF + K1, 0:C1].set(jnp.transpose(w1[:, 0, :], (1, 0)))
    w2k = jnp.transpose(w2, (2, 1, 0))                     # (K2, C1, C2)
    for j in range(K2):
        slab = slab.at[W2_OFF + C1 * j: W2_OFF + C1 * (j + 1), 0:C2].set(w2k[j])
    w3k = jnp.transpose(w3, (2, 1, 0))                     # (K3, C2, C3)
    for j in range(K3):
        slab = slab.at[W3_OFF + C2 * j: W3_OFF + C2 * (j + 1), 0:C3].set(w3k[j])
    # fc1: PyTorch flatten order is feature = c*P3 + p -> one (C3, DOMAINS) block per p.
    for p in range(P3):
        slab = slab.at[WF_OFF + C3 * p: WF_OFF + C3 * (p + 1), 0:DOMAINS].set(wfc[:, p::2].T)
    slab = slab.at[B_OFF + 0, 0:C1].set(b1)
    slab = slab.at[B_OFF + 1, 0:C2].set(b2)
    slab = slab.at[B_OFF + 2, 0:C3].set(b3)
    slab = slab.at[B_OFF + 3, 0:DOMAINS].set(bfc)
    return slab


@jax.jit
def domain_cnn_forward(x_ncl, w_slab):
    """x_ncl: (N, 1, L) float32 (PyTorch NCL layout). Returns softmax probs (N, DOMAINS)."""
    xs = x_ncl[:, 0, :].astype(jnp.float32)                                 # (N, L)
    # conv1 im2col with the pool1-friendly row permutation (static numpy indices).
    xw = xs[_n_idx[:, None], _t_idx[:, None] + _k_idx[None, :]]             # (108, 5)
    vspec = pl.BlockSpec(memory_space=pltpu.MemorySpace.VMEM)
    return pl.pallas_call(
        domain_cnn_kernel,
        out_shape=jax.ShapeDtypeStruct((N, DOMAINS), jnp.float32),
        in_specs=[vspec, vspec],
        out_specs=vspec,
    )(xw, w_slab)


@jax.jit
def domain_loss(outputs, targets):
    """Mean cross-entropy of `outputs` (treated as logits) against integer `targets`."""
    vspec = pl.BlockSpec(memory_space=pltpu.MemorySpace.VMEM)
    loss = pl.pallas_call(
        domain_loss_kernel,
        out_shape=jax.ShapeDtypeStruct((1, 1), jnp.float32),
        in_specs=[vspec, vspec],
        out_specs=vspec,
    )(outputs.astype(jnp.float32), targets.reshape(N, 1).astype(jnp.int32))
    return loss[0, 0]


# ------------------------- pure-JAX references (check) ------------------------
def reference_forward(x_ncl, params):
    w1, b1, w2, b2, w3, b3, wfc, bfc = params

    def conv1d(h, w, b, stride):
        y = lax.conv_general_dilated(h, w, (stride,), 'VALID',
                                     dimension_numbers=('NCH', 'OIH', 'NCH'))
        return y + b[None, :, None]

    def maxpool(h, k, s):
        return lax.reduce_window(h, -jnp.inf, lax.max, (1, 1, k), (1, 1, s), 'VALID')

    def elu(v):
        return jnp.where(v > 0, v, jnp.exp(jnp.minimum(v, 0.0)) - 1.0)

    h = maxpool(elu(conv1d(x_ncl, w1, b1, 1)), 2, 2)
    h = maxpool(elu(conv1d(h, w2, b2, 2)), 2, 2)
    h = maxpool(elu(conv1d(h, w3, b3, 2)), 2, 1)
    f = h.reshape(-1, C3 * P3)
    logits = f @ wfc.T + bfc[None, :]
    return jax.nn.softmax(logits, axis=1)


def reference_loss(outputs, targets):
    logp = jax.nn.log_softmax(outputs.astype(jnp.float32), axis=1)
    return -jnp.mean(logp[jnp.arange(outputs.shape[0]), targets])


if __name__ == "__main__":
    key = jax.random.PRNGKey(0)
    ks = jax.random.split(key, 10)

    def uinit(k, shape, fan_in):
        bound = 1.0 / np.sqrt(fan_in)
        return jax.random.uniform(k, shape, jnp.float32, -bound, bound)

    # parameter shapes from DomainCNN.__init__ (PyTorch conventions)
    w1 = uinit(ks[0], (C1, 1, K1), 1 * K1)
    b1 = uinit(ks[1], (C1,), 1 * K1)
    w2 = uinit(ks[2], (C2, C1, K2), C1 * K2)
    b2 = uinit(ks[3], (C2,), C1 * K2)
    w3 = uinit(ks[4], (C3, C2, K3), C2 * K3)
    b3 = uinit(ks[5], (C3,), C2 * K3)
    wfc = uinit(ks[6], (DOMAINS, C3 * P3), C3 * P3)
    bfc = uinit(ks[7], (DOMAINS,), C3 * P3)
    params = (w1, b1, w2, b2, w3, b3, wfc, bfc)

    x = jax.random.normal(ks[8], (N, 1, L), jnp.float32)
    targets = jax.random.randint(ks[9], (N,), 0, DOMAINS, dtype=jnp.int32)

    w_slab = prepare_params(params)            # repacked once, outside the hot path

    probs = jax.block_until_ready(domain_cnn_forward(x, w_slab))
    ref_probs = jax.block_until_ready(reference_forward(x, params))
    assert probs.shape == (N, DOMAINS)
    # tolerance covers TPU default (reduced-precision) matmul paths in both the kernel
    # and the XLA reference; pass precision=lax.Precision.HIGHEST for tighter parity.
    np.testing.assert_allclose(np.asarray(probs), np.asarray(ref_probs),
                               rtol=2e-3, atol=2e-3)

    loss = jax.block_until_ready(domain_loss(probs, targets))
    ref_l = jax.block_until_ready(reference_loss(probs, targets))
    np.testing.assert_allclose(float(loss), float(ref_l), rtol=1e-4, atol=1e-5)

    print("KERNEL_OK")
</pallas_src>

<mosaic_0001>
module attributes {stable_mosaic.version = 11 : i64} {
  func.func @domain_cnn_kernel(%arg0: memref<108x5xf32, #tpu.memory_space<vmem>>, %arg1: memref<224x32xf32, #tpu.memory_space<vmem>>, %arg2: memref<2x4xf32, #tpu.memory_space<vmem>>) attributes {dimension_semantics = [], scalar_prefetch = 0 : i64, scratch_operands = 0 : i64, tpu.core_type = #tpu.core_type<tc>} {
    %c0 = arith.constant 0 : index
    %c0_0 = arith.constant 0 : index
    %0 = vector.load %arg1[%c0, %c0_0] : memref<224x32xf32, #tpu.memory_space<vmem>>, vector<5x32xf32>
    %c8 = arith.constant 8 : index
    %c0_1 = arith.constant 0 : index
    %1 = vector.load %arg1[%c8, %c0_1] : memref<224x32xf32, #tpu.memory_space<vmem>>, vector<32x16xf32>
    %c40 = arith.constant 40 : index
    %c0_2 = arith.constant 0 : index
    %2 = vector.load %arg1[%c40, %c0_2] : memref<224x32xf32, #tpu.memory_space<vmem>>, vector<32x16xf32>
    %c72 = arith.constant 72 : index
    %c0_3 = arith.constant 0 : index
    %3 = vector.load %arg1[%c72, %c0_3] : memref<224x32xf32, #tpu.memory_space<vmem>>, vector<32x16xf32>
    %c104 = arith.constant 104 : index
    %c0_4 = arith.constant 0 : index
    %4 = vector.load %arg1[%c104, %c0_4] : memref<224x32xf32, #tpu.memory_space<vmem>>, vector<32x16xf32>
    %c136 = arith.constant 136 : index
    %c0_5 = arith.constant 0 : index
    %5 = vector.load %arg1[%c136, %c0_5] : memref<224x32xf32, #tpu.memory_space<vmem>>, vector<32x16xf32>
    %c168 = arith.constant 168 : index
    %c0_6 = arith.constant 0 : index
    %6 = vector.load %arg1[%c168, %c0_6] : memref<224x32xf32, #tpu.memory_space<vmem>>, vector<16x8xf32>
    %c184 = arith.constant 184 : index
    %c0_7 = arith.constant 0 : index
    %7 = vector.load %arg1[%c184, %c0_7] : memref<224x32xf32, #tpu.memory_space<vmem>>, vector<16x8xf32>
    %c200 = arith.constant 200 : index
    %c0_8 = arith.constant 0 : index
    %8 = vector.load %arg1[%c200, %c0_8] : memref<224x32xf32, #tpu.memory_space<vmem>>, vector<8x4xf32>
    %c208 = arith.constant 208 : index
    %c0_9 = arith.constant 0 : index
    %9 = vector.load %arg1[%c208, %c0_9] : memref<224x32xf32, #tpu.memory_space<vmem>>, vector<8x4xf32>
    %c216 = arith.constant 216 : index
    %c0_10 = arith.constant 0 : index
    %10 = vector.load %arg1[%c216, %c0_10] : memref<224x32xf32, #tpu.memory_space<vmem>>, vector<4x32xf32>
    %11 = vector.extract_strided_slice %10 {offsets = [0, 0], sizes = [1, 32], strides = [1, 1]} : vector<4x32xf32> to vector<1x32xf32>
    %12 = vector.extract_strided_slice %10 {offsets = [1, 0], sizes = [1, 16], strides = [1, 1]} : vector<4x32xf32> to vector<1x16xf32>
    %13 = vector.extract_strided_slice %10 {offsets = [2, 0], sizes = [1, 8], strides = [1, 1]} : vector<4x32xf32> to vector<1x8xf32>
    %14 = vector.extract_strided_slice %10 {offsets = [3, 0], sizes = [1, 4], strides = [1, 1]} : vector<4x32xf32> to vector<1x4xf32>
    %c0_11 = arith.constant 0 : index
    %c0_12 = arith.constant 0 : index
    %15 = vector.load %arg0[%c0_11, %c0_12] : memref<108x5xf32, #tpu.memory_space<vmem>>, vector<108x5xf32>
    %cst = arith.constant dense<0.000000e+00> : vector<108x32xf32>
    %16 = tpu.matmul %15, %0, %cst {dimension_numbers = #tpu.dot_dimension_numbers<[1], [0], [0], [1], [0, 0, 1, 1], [], []>} : vector<108x5xf32>, vector<5x32xf32>, vector<108x32xf32> -> vector<108x32xf32>
    %17 = vector.broadcast %11 : vector<1x32xf32> to vector<108x32xf32>
    %18 = arith.addf %16, %17 : vector<108x32xf32>
    %cst_13 = arith.constant 0.000000e+00 : f32
    %19 = vector.broadcast %cst_13 : f32 to vector<108x32xf32>
    %20 = arith.cmpf ogt, %18, %19 : vector<108x32xf32>
    %cst_14 = arith.constant 0.000000e+00 : f32
    %21 = vector.broadcast %cst_14 : f32 to vector<108x32xf32>
    %22 = arith.minimumf %18, %21 : vector<108x32xf32>
    %23 = math.exp %22 : vector<108x32xf32>
    %cst_15 = arith.constant 1.000000e+00 : f32
    %24 = vector.broadcast %cst_15 : f32 to vector<108x32xf32>
    %25 = arith.subf %23, %24 : vector<108x32xf32>
    %26 = arith.select %20, %18, %25 : vector<108x32xi1>, vector<108x32xf32>
    %27 = vector.extract_strided_slice %26 {offsets = [0, 0], sizes = [54, 32], strides = [1, 1]} : vector<108x32xf32> to vector<54x32xf32>
    %28 = vector.extract_strided_slice %26 {offsets = [54, 0], sizes = [54, 32], strides = [1, 1]} : vector<108x32xf32> to vector<54x32xf32>
    %29 = arith.maximumf %27, %28 : vector<54x32xf32>
    %30 = vector.extract_strided_slice %29 {offsets = [0, 0], sizes = [12, 32], strides = [1, 1]} : vector<54x32xf32> to vector<12x32xf32>
    %cst_16 = arith.constant dense<0.000000e+00> : vector<12x16xf32>
    %31 = tpu.matmul %30, %1, %cst_16 {dimension_numbers = #tpu.dot_dimension_numbers<[1], [0], [0], [1], [0, 0, 1, 1], [], []>} : vector<12x32xf32>, vector<32x16xf32>, vector<12x16xf32> -> vector<12x16xf32>
    %32 = vector.broadcast %12 : vector<1x16xf32> to vector<12x16xf32>
    %33 = arith.addf %32, %31 : vector<12x16xf32>
    %34 = vector.extract_strided_slice %29 {offsets = [14, 0], sizes = [12, 32], strides = [1, 1]} : vector<54x32xf32> to vector<12x32xf32>
    %cst_17 = arith.constant dense<0.000000e+00> : vector<12x16xf32>
    %35 = tpu.matmul %34, %2, %cst_17 {dimension_numbers = #tpu.dot_dimension_numbers<[1], [0], [0], [1], [0, 0, 1, 1], [], []>} : vector<12x32xf32>, vector<32x16xf32>, vector<12x16xf32> -> vector<12x16xf32>
    %36 = arith.addf %33, %35 : vector<12x16xf32>
    %37 = vector.extract_strided_slice %29 {offsets = [1, 0], sizes = [12, 32], strides = [1, 1]} : vector<54x32xf32> to vector<12x32xf32>
    %cst_18 = arith.constant dense<0.000000e+00> : vector<12x16xf32>
    %38 = tpu.matmul %37, %3, %cst_18 {dimension_numbers = #tpu.dot_dimension_numbers<[1], [0], [0], [1], [0, 0, 1, 1], [], []>} : vector<12x32xf32>, vector<32x16xf32>, vector<12x16xf32> -> vector<12x16xf32>
    %39 = arith.addf %36, %38 : vector<12x16xf32>
    %40 = vector.extract_strided_slice %29 {offsets = [15, 0], sizes = [12, 32], strides = [1, 1]} : vector<54x32xf32> to vector<12x32xf32>
    %cst_19 = arith.constant dense<0.000000e+00> : vector<12x16xf32>
    %41 = tpu.matmul %40, %4, %cst_19 {dimension_numbers = #tpu.dot_dimension_numbers<[1], [0], [0], [1], [0, 0, 1, 1], [], []>} : vector<12x32xf32>, vector<32x16xf32>, vector<12x16xf32> -> vector<12x16xf32>
    %42 = arith.addf %39, %41 : vector<12x16xf32>
    %43 = vector.extract_strided_slice %29 {offsets = [2, 0], sizes = [12, 32], strides = [1, 1]} : vector<54x32xf32> to vector<12x32xf32>
    %cst_20 = arith.constant dense<0.000000e+00> : vector<12x16xf32>
    %44 = tpu.matmul %43, %5, %cst_20 {dimension_numbers = #tpu.dot_dimension_numbers<[1], [0], [0], [1], [0, 0, 1, 1], [], []>} : vector<12x32xf32>, vector<32x16xf32>, vector<12x16xf32> -> vector<12x16xf32>
    %45 = arith.addf %42, %44 : vector<12x16xf32>
    %cst_21 = arith.constant 0.000000e+00 : f32
    %46 = vector.broadcast %cst_21 : f32 to vector<12x16xf32>
    %47 = arith.cmpf ogt, %45, %46 : vector<12x16xf32>
    %cst_22 = arith.constant 0.000000e+00 : f32
    %48 = vector.broadcast %cst_22 : f32 to vector<12x16xf32>
    %49 = arith.minimumf %45, %48 : vector<12x16xf32>
    %50 = math.exp %49 : vector<12x16xf32>
    %cst_23 = arith.constant 1.000000e+00 : f32
    %51 = vector.broadcast %cst_23 : f32 to vector<12x16xf32>
    %52 = arith.subf %50, %51 : vector<12x16xf32>
    %53 = arith.select %47, %45, %52 : vector<12x16xi1>, vector<12x16xf32>
    %54 = vector.extract_strided_slice %53 {offsets = [0, 0], sizes = [4, 16], strides = [1, 1]} : vector<12x16xf32> to vector<4x16xf32>
    %55 = vector.extract_strided_slice %54 {offsets = [0, 0], sizes = [1, 16], strides = [1, 1]} : vector<4x16xf32> to vector<1x16xf32>
    %56 = vector.extract_strided_slice %54 {offsets = [1, 0], sizes = [1, 16], strides = [1, 1]} : vector<4x16xf32> to vector<1x16xf32>
    %57 = arith.maximumf %55, %56 : vector<1x16xf32>
    %58 = vector.extract_strided_slice %54 {offsets = [2, 0], sizes = [1, 16], strides = [1, 1]} : vector<4x16xf32> to vector<1x16xf32>
    %59 = vector.extract_strided_slice %54 {offsets = [3, 0], sizes = [1, 16], strides = [1, 1]} : vector<4x16xf32> to vector<1x16xf32>
    %60 = arith.maximumf %58, %59 : vector<1x16xf32>
    %cst_24 = arith.constant dense<0.000000e+00> : vector<1x8xf32>
    %61 = tpu.matmul %57, %6, %cst_24 {dimension_numbers = #tpu.dot_dimension_numbers<[1], [0], [0], [1], [0, 0, 1, 1], [], []>} : vector<1x16xf32>, vector<16x8xf32>, vector<1x8xf32> -> vector<1x8xf32>
    %62 = arith.addf %13, %61 : vector<1x8xf32>
    %cst_25 = arith.constant dense<0.000000e+00> : vector<1x8xf32>
    %63 = tpu.matmul %60, %7, %cst_25 {dimension_numbers = #tpu.dot_dimension_numbers<[1], [0], [0], [1], [0, 0, 1, 1], [], []>} : vector<1x16xf32>, vector<16x8xf32>, vector<1x8xf32> -> vector<1x8xf32>
    %64 = arith.addf %62, %63 : vector<1x8xf32>
    %cst_26 = arith.constant 0.000000e+00 : f32
    %65 = vector.broadcast %cst_26 : f32 to vector<1x8xf32>
    %66 = arith.cmpf ogt, %64, %65 : vector<1x8xf32>
    %cst_27 = arith.constant 0.000000e+00 : f32
    %67 = vector.broadcast %cst_27 : f32 to vector<1x8xf32>
    %68 = arith.minimumf %64, %67 : vector<1x8xf32>
    %69 = math.exp %68 : vector<1x8xf32>
    %cst_28 = arith.constant 1.000000e+00 : f32
    %70 = vector.broadcast %cst_28 : f32 to vector<1x8xf32>
    %71 = arith.subf %69, %70 : vector<1x8xf32>
    %72 = arith.select %66, %64, %71 : vector<1x8xi1>, vector<1x8xf32>
    %73 = vector.extract_strided_slice %53 {offsets = [4, 0], sizes = [4, 16], strides = [1, 1]} : vector<12x16xf32> to vector<4x16xf32>
    %74 = vector.extract_strided_slice %73 {offsets = [0, 0], sizes = [1, 16], strides = [1, 1]} : vector<4x16xf32> to vector<1x16xf32>
    %75 = vector.extract_strided_slice %73 {offsets = [1, 0], sizes = [1, 16], strides = [1, 1]} : vector<4x16xf32> to vector<1x16xf32>
    %76 = arith.maximumf %74, %75 : vector<1x16xf32>
    %77 = vector.extract_strided_slice %73 {offsets = [2, 0], sizes = [1, 16], strides = [1, 1]} : vector<4x16xf32> to vector<1x16xf32>
    %78 = vector.extract_strided_slice %73 {offsets = [3, 0], sizes = [1, 16], strides = [1, 1]} : vector<4x16xf32> to vector<1x16xf32>
    %79 = arith.maximumf %77, %78 : vector<1x16xf32>
    %cst_29 = arith.constant dense<0.000000e+00> : vector<1x8xf32>
    %80 = tpu.matmul %76, %6, %cst_29 {dimension_numbers = #tpu.dot_dimension_numbers<[1], [0], [0], [1], [0, 0, 1, 1], [], []>} : vector<1x16xf32>, vector<16x8xf32>, vector<1x8xf32> -> vector<1x8xf32>
    %81 = arith.addf %13, %80 : vector<1x8xf32>
    %cst_30 = arith.constant dense<0.000000e+00> : vector<1x8xf32>
    %82 = tpu.matmul %79, %7, %cst_30 {dimension_numbers = #tpu.dot_dimension_numbers<[1], [0], [0], [1], [0, 0, 1, 1], [], []>} : vector<1x16xf32>, vector<16x8xf32>, vector<1x8xf32> -> vector<1x8xf32>
    %83 = arith.addf %81, %82 : vector<1x8xf32>
    %cst_31 = arith.constant 0.000000e+00 : f32
    %84 = vector.broadcast %cst_31 : f32 to vector<1x8xf32>
    %85 = arith.cmpf ogt, %83, %84 : vector<1x8xf32>
    %cst_32 = arith.constant 0.000000e+00 : f32
    %86 = vector.broadcast %cst_32 : f32 to vector<1x8xf32>
    %87 = arith.minimumf %83, %86 : vector<1x8xf32>
    %88 = math.exp %87 : vector<1x8xf32>
    %cst_33 = arith.constant 1.000000e+00 : f32
    %89 = vector.broadcast %cst_33 : f32 to vector<1x8xf32>
    %90 = arith.subf %88, %89 : vector<1x8xf32>
    %91 = arith.select %85, %83, %90 : vector<1x8xi1>, vector<1x8xf32>
    %92 = vector.extract_strided_slice %53 {offsets = [8, 0], sizes = [4, 16], strides = [1, 1]} : vector<12x16xf32> to vector<4x16xf32>
    %93 = vector.extract_strided_slice %92 {offsets = [0, 0], sizes = [1, 16], strides = [1, 1]} : vector<4x16xf32> to vector<1x16xf32>
    %94 = vector.extract_strided_slice %92 {offsets = [1, 0], sizes = [1, 16], strides = [1, 1]} : vector<4x16xf32> to vector<1x16xf32>
    %95 = arith.maximumf %93, %94 : vector<1x16xf32>
    %96 = vector.extract_strided_slice %92 {offsets = [2, 0], sizes = [1, 16], strides = [1, 1]} : vector<4x16xf32> to vector<1x16xf32>
    %97 = vector.extract_strided_slice %92 {offsets = [3, 0], sizes = [1, 16], strides = [1, 1]} : vector<4x16xf32> to vector<1x16xf32>
    %98 = arith.maximumf %96, %97 : vector<1x16xf32>
    %cst_34 = arith.constant dense<0.000000e+00> : vector<1x8xf32>
    %99 = tpu.matmul %95, %6, %cst_34 {dimension_numbers = #tpu.dot_dimension_numbers<[1], [0], [0], [1], [0, 0, 1, 1], [], []>} : vector<1x16xf32>, vector<16x8xf32>, vector<1x8xf32> -> vector<1x8xf32>
    %100 = arith.addf %13, %99 : vector<1x8xf32>
    %cst_35 = arith.constant dense<0.000000e+00> : vector<1x8xf32>
    %101 = tpu.matmul %98, %7, %cst_35 {dimension_numbers = #tpu.dot_dimension_numbers<[1], [0], [0], [1], [0, 0, 1, 1], [], []>} : vector<1x16xf32>, vector<16x8xf32>, vector<1x8xf32> -> vector<1x8xf32>
    %102 = arith.addf %100, %101 : vector<1x8xf32>
    %cst_36 = arith.constant 0.000000e+00 : f32
    %103 = vector.broadcast %cst_36 : f32 to vector<1x8xf32>
    %104 = arith.cmpf ogt, %102, %103 : vector<1x8xf32>
    %cst_37 = arith.constant 0.000000e+00 : f32
    %105 = vector.broadcast %cst_37 : f32 to vector<1x8xf32>
    %106 = arith.minimumf %102, %105 : vector<1x8xf32>
    %107 = math.exp %106 : vector<1x8xf32>
    %cst_38 = arith.constant 1.000000e+00 : f32
    %108 = vector.broadcast %cst_38 : f32 to vector<1x8xf32>
    %109 = arith.subf %107, %108 : vector<1x8xf32>
    %110 = arith.select %104, %102, %109 : vector<1x8xi1>, vector<1x8xf32>
    %111 = arith.maximumf %72, %91 : vector<1x8xf32>
    %112 = arith.maximumf %91, %110 : vector<1x8xf32>
    %cst_39 = arith.constant dense<0.000000e+00> : vector<1x4xf32>
    %113 = tpu.matmul %111, %8, %cst_39 {dimension_numbers = #tpu.dot_dimension_numbers<[1], [0], [0], [1], [0, 0, 1, 1], [], []>} : vector<1x8xf32>, vector<8x4xf32>, vector<1x4xf32> -> vector<1x4xf32>
    %114 = arith.addf %14, %113 : vector<1x4xf32>
    %cst_40 = arith.constant dense<0.000000e+00> : vector<1x4xf32>
    %115 = tpu.matmul %112, %9, %cst_40 {dimension_numbers = #tpu.dot_dimension_numbers<[1], [0], [0], [1], [0, 0, 1, 1], [], []>} : vector<1x8xf32>, vector<8x4xf32>, vector<1x4xf32> -> vector<1x4xf32>
    %116 = arith.addf %114, %115 : vector<1x4xf32>
    %117 = vector.extract_strided_slice %29 {offsets = [27, 0], sizes = [12, 32], strides = [1, 1]} : vector<54x32xf32> to vector<12x32xf32>
    %cst_41 = arith.constant dense<0.000000e+00> : vector<12x16xf32>
    %118 = tpu.matmul %117, %1, %cst_41 {dimension_numbers = #tpu.dot_dimension_numbers<[1], [0], [0], [1], [0, 0, 1, 1], [], []>} : vector<12x32xf32>, vector<32x16xf32>, vector<12x16xf32> -> vector<12x16xf32>
    %119 = vector.broadcast %12 : vector<1x16xf32> to vector<12x16xf32>
    %120 = arith.addf %119, %118 : vector<12x16xf32>
    %121 = vector.extract_strided_slice %29 {offsets = [41, 0], sizes = [12, 32], strides = [1, 1]} : vector<54x32xf32> to vector<12x32xf32>
    %cst_42 = arith.constant dense<0.000000e+00> : vector<12x16xf32>
    %122 = tpu.matmul %121, %2, %cst_42 {dimension_numbers = #tpu.dot_dimension_numbers<[1], [0], [0], [1], [0, 0, 1, 1], [], []>} : vector<12x32xf32>, vector<32x16xf32>, vector<12x16xf32> -> vector<12x16xf32>
    %123 = arith.addf %120, %122 : vector<12x16xf32>
    %124 = vector.extract_strided_slice %29 {offsets = [28, 0], sizes = [12, 32], strides = [1, 1]} : vector<54x32xf32> to vector<12x32xf32>
    %cst_43 = arith.constant dense<0.000000e+00> : vector<12x16xf32>
    %125 = tpu.matmul %124, %3, %cst_43 {dimension_numbers = #tpu.dot_dimension_numbers<[1], [0], [0], [1], [0, 0, 1, 1], [], []>} : vector<12x32xf32>, vector<32x16xf32>, vector<12x16xf32> -> vector<12x16xf32>
    %126 = arith.addf %123, %125 : vector<12x16xf32>
    %127 = vector.extract_strided_slice %29 {offsets = [42, 0], sizes = [12, 32], strides = [1, 1]} : vector<54x32xf32> to vector<12x32xf32>
    %cst_44 = arith.constant dense<0.000000e+00> : vector<12x16xf32>
    %128 = tpu.matmul %127, %4, %cst_44 {dimension_numbers = #tpu.dot_dimension_numbers<[1], [0], [0], [1], [0, 0, 1, 1], [], []>} : vector<12x32xf32>, vector<32x16xf32>, vector<12x16xf32> -> vector<12x16xf32>
    %129 = arith.addf %126, %128 : vector<12x16xf32>
    %130 = vector.extract_strided_slice %29 {offsets = [29, 0], sizes = [12, 32], strides = [1, 1]} : vector<54x32xf32> to vector<12x32xf32>
    %cst_45 = arith.constant dense<0.000000e+00> : vector<12x16xf32>
    %131 = tpu.matmul %130, %5, %cst_45 {dimension_numbers = #tpu.dot_dimension_numbers<[1], [0], [0], [1], [0, 0, 1, 1], [], []>} : vector<12x32xf32>, vector<32x16xf32>, vector<12x16xf32> -> vector<12x16xf32>
    %132 = arith.addf %129, %131 : vector<12x16xf32>
    %cst_46 = arith.constant 0.000000e+00 : f32
    %133 = vector.broadcast %cst_46 : f32 to vector<12x16xf32>
    %134 = arith.cmpf ogt, %132, %133 : vector<12x16xf32>
    %cst_47 = arith.constant 0.000000e+00 : f32
    %135 = vector.broadcast %cst_47 : f32 to vector<12x16xf32>
    %136 = arith.minimumf %132, %135 : vector<12x16xf32>
    %137 = math.exp %136 : vector<12x16xf32>
    %cst_48 = arith.constant 1.000000e+00 : f32
    %138 = vector.broadcast %cst_48 : f32 to vector<12x16xf32>
    %139 = arith.subf %137, %138 : vector<12x16xf32>
    %140 = arith.select %134, %132, %139 : vector<12x16xi1>, vector<12x16xf32>
    %141 = vector.extract_strided_slice %140 {offsets = [0, 0], sizes = [4, 16], strides = [1, 1]} : vector<12x16xf32> to vector<4x16xf32>
    %142 = vector.extract_strided_slice %141 {offsets = [0, 0], sizes = [1, 16], strides = [1, 1]} : vector<4x16xf32> to vector<1x16xf32>
    %143 = vector.extract_strided_slice %141 {offsets = [1, 0], sizes = [1, 16], strides = [1, 1]} : vector<4x16xf32> to vector<1x16xf32>
    %144 = arith.maximumf %142, %143 : vector<1x16xf32>
    %145 = vector.extract_strided_slice %141 {offsets = [2, 0], sizes = [1, 16], strides = [1, 1]} : vector<4x16xf32> to vector<1x16xf32>
    %146 = vector.extract_strided_slice %141 {offsets = [3, 0], sizes = [1, 16], strides = [1, 1]} : vector<4x16xf32> to vector<1x16xf32>
    %147 = arith.maximumf %145, %146 : vector<1x16xf32>
    %cst_49 = arith.constant dense<0.000000e+00> : vector<1x8xf32>
    %148 = tpu.matmul %144, %6, %cst_49 {dimension_numbers = #tpu.dot_dimension_numbers<[1], [0], [0], [1], [0, 0, 1, 1], [], []>} : vector<1x16xf32>, vector<16x8xf32>, vector<1x8xf32> -> vector<1x8xf32>
    %149 = arith.addf %13, %148 : vector<1x8xf32>
    %cst_50 = arith.constant dense<0.000000e+00> : vector<1x8xf32>
    %150 = tpu.matmul %147, %7, %cst_50 {dimension_numbers = #tpu.dot_dimension_numbers<[1], [0], [0], [1], [0, 0, 1, 1], [], []>} : vector<1x16xf32>, vector<16x8xf32>, vector<1x8xf32> -> vector<1x8xf32>
    %151 = arith.addf %149, %150 : vector<1x8xf32>
    %cst_51 = arith.constant 0.000000e+00 : f32
    %152 = vector.broadcast %cst_51 : f32 to vector<1x8xf32>
    %153 = arith.cmpf ogt, %151, %152 : vector<1x8xf32>
    %cst_52 = arith.constant 0.000000e+00 : f32
    %154 = vector.broadcast %cst_52 : f32 to vector<1x8xf32>
    %155 = arith.minimumf %151, %154 : vector<1x8xf32>
    %156 = math.exp %155 : vector<1x8xf32>
    %cst_53 = arith.constant 1.000000e+00 : f32
    %157 = vector.broadcast %cst_53 : f32 to vector<1x8xf32>
    %158 = arith.subf %156, %157 : vector<1x8xf32>
    %159 = arith.select %153, %151, %158 : vector<1x8xi1>, vector<1x8xf32>
    %160 = vector.extract_strided_slice %140 {offsets = [4, 0], sizes = [4, 16], strides = [1, 1]} : vector<12x16xf32> to vector<4x16xf32>
    %161 = vector.extract_strided_slice %160 {offsets = [0, 0], sizes = [1, 16], strides = [1, 1]} : vector<4x16xf32> to vector<1x16xf32>
    %162 = vector.extract_strided_slice %160 {offsets = [1, 0], sizes = [1, 16], strides = [1, 1]} : vector<4x16xf32> to vector<1x16xf32>
    %163 = arith.maximumf %161, %162 : vector<1x16xf32>
    %164 = vector.extract_strided_slice %160 {offsets = [2, 0], sizes = [1, 16], strides = [1, 1]} : vector<4x16xf32> to vector<1x16xf32>
    %165 = vector.extract_strided_slice %160 {offsets = [3, 0], sizes = [1, 16], strides = [1, 1]} : vector<4x16xf32> to vector<1x16xf32>
    %166 = arith.maximumf %164, %165 : vector<1x16xf32>
    %cst_54 = arith.constant dense<0.000000e+00> : vector<1x8xf32>
    %167 = tpu.matmul %163, %6, %cst_54 {dimension_numbers = #tpu.dot_dimension_numbers<[1], [0], [0], [1], [0, 0, 1, 1], [], []>} : vector<1x16xf32>, vector<16x8xf32>, vector<1x8xf32> -> vector<1x8xf32>
    %168 = arith.addf %13, %167 : vector<1x8xf32>
    %cst_55 = arith.constant dense<0.000000e+00> : vector<1x8xf32>
    %169 = tpu.matmul %166, %7, %cst_55 {dimension_numbers = #tpu.dot_dimension_numbers<[1], [0], [0], [1], [0, 0, 1, 1], [], []>} : vector<1x16xf32>, vector<16x8xf32>, vector<1x8xf32> -> vector<1x8xf32>
    %170 = arith.addf %168, %169 : vector<1x8xf32>
    %cst_56 = arith.constant 0.000000e+00 : f32
    %171 = vector.broadcast %cst_56 : f32 to vector<1x8xf32>
    %172 = arith.cmpf ogt, %170, %171 : vector<1x8xf32>
    %cst_57 = arith.constant 0.000000e+00 : f32
    %173 = vector.broadcast %cst_57 : f32 to vector<1x8xf32>
    %174 = arith.minimumf %170, %173 : vector<1x8xf32>
    %175 = math.exp %174 : vector<1x8xf32>
    %cst_58 = arith.constant 1.000000e+00 : f32
    %176 = vector.broadcast %cst_58 : f32 to vector<1x8xf32>
    %177 = arith.subf %175, %176 : vector<1x8xf32>
    %178 = arith.select %172, %170, %177 : vector<1x8xi1>, vector<1x8xf32>
    %179 = vector.extract_strided_slice %140 {offsets = [8, 0], sizes = [4, 16], strides = [1, 1]} : vector<12x16xf32> to vector<4x16xf32>
    %180 = vector.extract_strided_slice %179 {offsets = [0, 0], sizes = [1, 16], strides = [1, 1]} : vector<4x16xf32> to vector<1x16xf32>
    %181 = vector.extract_strided_slice %179 {offsets = [1, 0], sizes = [1, 16], strides = [1, 1]} : vector<4x16xf32> to vector<1x16xf32>
    %182 = arith.maximumf %180, %181 : vector<1x16xf32>
    %183 = vector.extract_strided_slice %179 {offsets = [2, 0], sizes = [1, 16], strides = [1, 1]} : vector<4x16xf32> to vector<1x16xf32>
    %184 = vector.extract_strided_slice %179 {offsets = [3, 0], sizes = [1, 16], strides = [1, 1]} : vector<4x16xf32> to vector<1x16xf32>
    %185 = arith.maximumf %183, %184 : vector<1x16xf32>
    %cst_59 = arith.constant dense<0.000000e+00> : vector<1x8xf32>
    %186 = tpu.matmul %182, %6, %cst_59 {dimension_numbers = #tpu.dot_dimension_numbers<[1], [0], [0], [1], [0, 0, 1, 1], [], []>} : vector<1x16xf32>, vector<16x8xf32>, vector<1x8xf32> -> vector<1x8xf32>
    %187 = arith.addf %13, %186 : vector<1x8xf32>
    %cst_60 = arith.constant dense<0.000000e+00> : vector<1x8xf32>
    %188 = tpu.matmul %185, %7, %cst_60 {dimension_numbers = #tpu.dot_dimension_numbers<[1], [0], [0], [1], [0, 0, 1, 1], [], []>} : vector<1x16xf32>, vector<16x8xf32>, vector<1x8xf32> -> vector<1x8xf32>
    %189 = arith.addf %187, %188 : vector<1x8xf32>
    %cst_61 = arith.constant 0.000000e+00 : f32
    %190 = vector.broadcast %cst_61 : f32 to vector<1x8xf32>
    %191 = arith.cmpf ogt, %189, %190 : vector<1x8xf32>
    %cst_62 = arith.constant 0.000000e+00 : f32
    %192 = vector.broadcast %cst_62 : f32 to vector<1x8xf32>
    %193 = arith.minimumf %189, %192 : vector<1x8xf32>
    %194 = math.exp %193 : vector<1x8xf32>
    %cst_63 = arith.constant 1.000000e+00 : f32
    %195 = vector.broadcast %cst_63 : f32 to vector<1x8xf32>
    %196 = arith.subf %194, %195 : vector<1x8xf32>
    %197 = arith.select %191, %189, %196 : vector<1x8xi1>, vector<1x8xf32>
    %198 = arith.maximumf %159, %178 : vector<1x8xf32>
    %199 = arith.maximumf %178, %197 : vector<1x8xf32>
    %cst_64 = arith.constant dense<0.000000e+00> : vector<1x4xf32>
    %200 = tpu.matmul %198, %8, %cst_64 {dimension_numbers = #tpu.dot_dimension_numbers<[1], [0], [0], [1], [0, 0, 1, 1], [], []>} : vector<1x8xf32>, vector<8x4xf32>, vector<1x4xf32> -> vector<1x4xf32>
    %201 = arith.addf %14, %200 : vector<1x4xf32>
    %cst_65 = arith.constant dense<0.000000e+00> : vector<1x4xf32>
    %202 = tpu.matmul %199, %9, %cst_65 {dimension_numbers = #tpu.dot_dimension_numbers<[1], [0], [0], [1], [0, 0, 1, 1], [], []>} : vector<1x8xf32>, vector<8x4xf32>, vector<1x4xf32> -> vector<1x4xf32>
    %203 = arith.addf %201, %202 : vector<1x4xf32>
    %204 = tpu.concatenate %116, %203 in 0 : vector<1x4xf32>, vector<1x4xf32> -> vector<2x4xf32>
    %cst_66 = arith.constant dense<0xFF800000> : vector<2xf32>
    %205 = vector.multi_reduction <maximumf>, %204, %cst_66 [1] : vector<2x4xf32> to vector<2xf32>
    %206 = vector.shape_cast %205 : vector<2xf32> to vector<2x1xf32>
    %207 = vector.broadcast %206 : vector<2x1xf32> to vector<2x4xf32>
    %208 = arith.subf %204, %207 : vector<2x4xf32>
    %209 = math.exp %208 : vector<2x4xf32>
    %cst_67 = arith.constant dense<0.000000e+00> : vector<2xf32>
    %210 = vector.multi_reduction <add>, %209, %cst_67 [1] : vector<2x4xf32> to vector<2xf32>
    %211 = vector.shape_cast %210 : vector<2xf32> to vector<2x1xf32>
    %212 = vector.broadcast %211 : vector<2x1xf32> to vector<2x4xf32>
    %213 = arith.divf %209, %212 : vector<2x4xf32>
    %c0_68 = arith.constant 0 : index
    %c0_69 = arith.constant 0 : index
    %214 = vector.load %arg2[%c0_68, %c0_69] : memref<2x4xf32, #tpu.memory_space<vmem>>, vector<2x4xf32>
    tpu.vector_store %arg2[%c0_68, %c0_69], %213 {strides = array<i32>} : memref<2x4xf32, #tpu.memory_space<vmem>>, vector<2x4xf32>,
    return
  }
}

</mosaic_0001>

<bundles_post_ra>
// kernel: domain_cnn_forward.1
= control target key start
LH: loop header
LB: loop body
LE: loop exit
PB: predicated region body
PF: predicated region fallthrough
CT: control target
= control target key end

     0   :  { %vm101_vm0 = vcmask 1044480   ;;  %vm58_vm1 = vcmask 39936   ;;  %s3768_s0 = inlined_call_operand.vmem [shape: f32[108,5], index: 0, kind: input, shape index: {}]   ;;  %s3769_s1 = inlined_call_operand.vmem [shape: f32[224,32], index: 1, kind: input, shape index: {}]   ;;  %s3770_s2 = inlined_call_operand.hbm [shape: f32[2,4], index: 2, kind: output, shape index: {}]  }
   0x1   :  { %v12_v0 = vld [vmem:[%s3769_s1] sm:$0x1f]  ;;  %v41_v2 = vld [vmem:[%s3768_s0 + $0x8] sm:$0xff]  ;;  %v42_v3 = vld [vmem:[%s3768_s0 + $0x10] sm:$0xff] }
   0x2   :  { %v40_v1 = vld [vmem:[%s3768_s0] sm:$0xff]  ;;  %2768 = vmatprep.subr.msk.mxu0 %vm101_vm0, %v12_v0  ;;  %v43_v4 = vld [vmem:[%s3768_s0 + $0x18] sm:$0xff] }
   0x3   :  { %2770 = vmatprep.mubr.msk.f32.mxu0 %vm58_vm1, %v40_v1  ;;  %2769 = vmatpush3.msk.msra.mxu0 %vm101_vm0, %v12_v0  ;;  %v44_v5 = vld [vmem:[%s3768_s0 + $0x20] sm:$0xff] }
   0x4   :  { %2771 = vmatmul.mubr.msk.f32.vlgmr.msra.gmra.mrb[0].mxu0 %vm58_vm1, %v41_v2 }
   0x5   :  { %2773 = vmatprep.mubr.msk.f32.mxu0 %vm58_vm1, %v42_v3 }
   0x6   :  { %7 = vsyncpa [#allocation3], 0  ;;  %v45_v6 = vld [vmem:[%s3768_s0 + $0x28] sm:$0xff]  ;;  %v46_v7 = vld [vmem:[%s3768_s0 + $0x30] sm:$0xff]  ;;  %v54_v30 = vlaneseq  ;;  %vm332_vm2 = vcmask 1041408   ;;  %vm362_vm4 = vcmask 261120  }
   0x7   :  { %v47_v8 = vld [vmem:[%s3768_s0 + $0x38] sm:$0xff]  ;;  %v48_v9 = vld [vmem:[%s3768_s0 + $0x40] sm:$0xff]  ;;  %v49_v10 = vld [vmem:[%s3768_s0 + $0x48] sm:$0xff]  ;;  %vm538_vm14 = vcmask 1046528  }
   0x8   :  { %2774 = vmatmul.mubr.msk.f32.gmra.mrb[2].mxu0 %vm58_vm1, %v43_v4  ;;  %v50_v11 = vld [vmem:[%s3768_s0 + $0x50] sm:$0xff]  ;;  %v51_v12 = vld [vmem:[%s3768_s0 + $0x58] sm:$0xff]  ;;  %v52_v13 = vld [vmem:[%s3768_s0 + $0x60] sm:$0xff]  ;;  %v3350_v31 = vshrl.u32 %v54_v30, 7 }
   0x9   :  { %2776 = vmatprep.mubr.msk.f32.mxu0 %vm58_vm1, %v44_v5  ;;  %v53_v14 = vld [vmem:[%s3768_s0 + $0x68] sm:$0xf]  ;;  %v14_v16 = vld [vmem:[%s3769_s1 + $0x10] sm:$0xff]  ;;  %v15_v18 = vld [vmem:[%s3769_s1 + $0x18] sm:$0xff] }
   0xa   :  { %v13_v15 = vld [vmem:[%s3769_s1 + $0x8] sm:$0xff]  ;;  %v16_v19 = vld [vmem:[%s3769_s1 + $0x20] sm:$0xff]  ;;  %v18_v22 = vld [vmem:[%s3769_s1 + $0x30] sm:$0xff]  ;;  %v56_v32 = vsub.s32 0, %v3350_v31 }
   0xb   :  { %v3307_v17 = vpack.c.bf16 %v14_v16, %v13_v15  ;;  %v3317_v20 = vpack.c.bf16 %v16_v19, %v15_v18  ;;  %v17_v21 = vld [vmem:[%s3769_s1 + $0x28] sm:$0xff]  ;;  %v19_v24 = vld [vmem:[%s3769_s1 + $0x38] sm:$0xff]  ;;  %v20_v25 = vld [vmem:[%s3769_s1 + $0x40] sm:$0xff] }
   0xc   :  { %2777 = vmatmul.mubr.msk.f32.gmra.mrb[4].mxu0 %vm58_vm1, %v45_v6  ;;  %v3327_v23 = vpack.c.bf16 %v18_v22, %v17_v21  ;;  %v3337_v26 = vpack.c.bf16 %v20_v25, %v19_v24  ;;  %v21_v27 = vld [vmem:[%s3769_s1 + $0x48] sm:$0xff]  ;;  %v22_v28 = vld [vmem:[%s3769_s1 + $0x50] sm:$0xff]  ;;  %v3356_v33 = vld [vmem:[%s3769_s1 + $0xd8] sm:$0xf] }
   0xd   :  { %2779 = vmatprep.mubr.msk.f32.mxu0 %vm58_vm1, %v46_v7  ;;  %3006 = vmatprep.subr.bf16.mxu0 %v3307_v17  ;;  %v3347_v29 = vpack.c.bf16 %v22_v28, %v21_v27  ;;  %v3359_v34 = vrot.slane %v3356_v33, %v56_v32  ;;  %v23_v19 = vld [vmem:[%s3769_s1 + $0x58] sm:$0xff]  ;;  %v24_v21 = vld [vmem:[%s3769_s1 + $0x60] sm:$0xff]  ;;  %v25_v28 = vld [vmem:[%s3769_s1 + $0x68] sm:$0xff] }
   0xe   :  { %3008 = vmatpush3.bf16.msra.mxu0 %v3307_v17  ;;  %3014 = vmatprep.subr.bf16.mxu1 %v3327_v23  ;;  %v26_v30 = vld [vmem:[%s3769_s1 + $0x70] sm:$0xff] }
   0xf   :  { %3010 = vmatprep.subr.bf16.mxu0 %v3317_v20  ;;  %3016 = vmatpush3.bf16.msra.mxu1 %v3327_v23 }
  0x10   :  { %2780 = vmatmul.mubr.msk.f32.gmra.mrb[6].mxu0 %vm58_vm1, %v47_v8  ;;  %3018 = vmatprep.subr.bf16.mxu1 %v3337_v26 }
  0x11   :  { %2782 = vmatprep.mubr.msk.f32.mxu0 %vm58_vm1, %v48_v9 }
  0x12   :  { %3012 = vmatpush3.bf16.msra.mxu0 %v3317_v20 }
  0x13   :  { %3020 = vmatpush3.bf16.msra.mxu1 %v3337_v26 }
  0x14   :  { %2783 = vmatmul.mubr.msk.f32.gmra.mrb[8].mxu0 %vm58_vm1, %v49_v10  ;;  %3022 = vmatprep.subr.bf16.mxu1 %v3347_v29 }
  0x15   :  { %2785 = vmatprep.mubr.msk.f32.mxu0 %vm58_vm1, %v50_v11 }
  0x18   :  { %2786 = vmatmul.mubr.msk.f32.gmra.mrb[10].mxu0 %vm58_vm1, %v51_v12 }
  0x19   :  { %2788 = vmatprep.mubr.msk.f32.mxu0 %vm58_vm1, %v52_v13 }
  0x1c   :  { %2789 = vmatmul.mubr.msk.f32.gmra.mrb[12].mxu0 %vm58_vm1, %v53_v14  ;;  %vm623_vm1 = vcmask 1040384  }
  0xd7   :  { %v2772_v35 = vpop.f32.mrb[0].mxu0 }
  0xd8   :  { %v171_v36 = vpop.f32.mrb[1].mxu0  ;;  %v3362_v37 = vadd.f32 %v2772_v35, %v3359_v34 }
  0xd9   :  { %v3365_v38 = vadd.f32 %v171_v36, %v3359_v34 }
  0xda   :  { %v255_v43 = vmin.f32 %v3362_v37, 0.0  ;;  %vm241_vm3 = vcmp.gt.f32.partialorder %v3362_v37, 0.0 }
  0xdb   :  { %v2775_v39 = vpop.f32.mrb[2].mxu0  ;;  %v254_v44 = vmin.f32 %v3365_v38, 0.0  ;;  %vm240_vm5 = vcmp.gt.f32.partialorder %v3365_v38, 0.0 }
  0xdc   :  { %v3368_v40 = vadd.f32 %v2775_v39, %v3359_v34  ;;  %v181_v41 = vpop.f32.mrb[3].mxu0  ;;  %v270_v51 = vmul.f32 1.442695, %v255_v43  ;;  %v3428_v43 = vpack.c.bf16 %v24_v21, %v23_v19 }
  0xdd   :  { %v3371_v42 = vadd.f32 %v181_v41, %v3359_v34  ;;  %v268_v52 = vmul.f32 1.442695, %v254_v44 }
  0xde   :  { %v257_v46 = vmin.f32 %v3368_v40, 0.0  ;;  %3145 = vpow2.f32 %v270_v51  ;;  %vm243_vm6 = vcmp.gt.f32.partialorder %v3368_v40, 0.0 }
  0xdf   :  { %v2778_v45 = vpop.f32.mrb[4].mxu0  ;;  %v256_v49 = vmin.f32 %v3371_v42, 0.0  ;;  %3147 = vpow2.f32 %v268_v52  ;;  %vm242_vm7 = vcmp.gt.f32.partialorder %v3371_v42, 0.0 }
  0xe0   :  { %v3377_v47 = vadd.f32 %v2778_v45, %v3359_v34  ;;  %v191_v48 = vpop.f32.mrb[5].mxu0  ;;  %v274_v54 = vmul.f32 1.442695, %v257_v46  ;;  %v3432_v46 = vpack.c.bf16 %v26_v30, %v25_v28 }
  0xe1   :  { %v3381_v50 = vadd.f32 %v191_v48, %v3359_v34  ;;  %v272_v58 = vmul.f32 1.442695, %v256_v49 }
  0xe2   :  { %v259_v55 = vmin.f32 %v3377_v47, 0.0  ;;  %3149 = vpow2.f32 %v274_v54  ;;  %vm245_vm8 = vcmp.gt.f32.partialorder %v3377_v47, 0.0 }
  0xe3   :  { %v2781_v53 = vpop.f32.mrb[6].mxu0  ;;  %v258_v59 = vmin.f32 %v3381_v50, 0.0  ;;  %3151 = vpow2.f32 %v272_v58  ;;  %vm244_vm10 = vcmp.gt.f32.partialorder %v3381_v50, 0.0 }
  0xe4   :  { %v3385_v56 = vadd.f32 %v2781_v53, %v3359_v34  ;;  %v201_v57 = vpop.f32.mrb[7].mxu0  ;;  %v278_v0 = vmul.f32 1.442695, %v259_v55 }
  0xe5   :  { %v3389_v60 = vadd.f32 %v201_v57, %v3359_v34  ;;  %v276_v4 = vmul.f32 1.442695, %v258_v59 }
  0xe6   :  { %v261_v61 = vmin.f32 %v3385_v56, 0.0  ;;  %vm247_vm9 = vcmp.gt.f32.partialorder %v3385_v56, 0.0 }
  0xe7   :  { %v260_v62 = vmin.f32 %v3389_v60, 0.0  ;;  %v2784_v63 = vpop.f32.mrb[8].mxu0  ;;  %vm246_vm11 = vcmp.gt.f32.partialorder %v3389_v60, 0.0 }
  0xe8   :  { %v282_v1 = vmul.f32 1.442695, %v261_v61  ;;  %v3394_v2 = vadd.f32 %v2784_v63, %v3359_v34  ;;  %v211_v3 = vpop.f32.mrb[9].mxu0  ;;  %v3146_v22 = vpop.eup %3145 }
  0xe9   :  { %v280_v5 = vmul.f32 1.442695, %v260_v62  ;;  %v3397_v6 = vadd.f32 %v211_v3, %v3359_v34  ;;  %v3148_v32 = vpop.eup %3147  ;;  %v2590_v51 = vadd.f32 -1.0, %v3146_v22 }
  0xea   :  { %3153 = vpow2.f32 %v282_v1  ;;  %v263_v7 = vmin.f32 %v3394_v2, 0.0  ;;  %v2589_v55 = vadd.f32 -1.0, %v3148_v32  ;;  %vm249_vm12 = vcmp.gt.f32.partialorder %v3394_v2, 0.0 }
  0xeb   :  { %3155 = vpow2.f32 %v280_v5  ;;  %v262_v8 = vmin.f32 %v3397_v6, 0.0  ;;  %v2787_v9 = vpop.f32.mrb[10].mxu0  ;;  %v311_v3 = vsel %vm241_vm3, %v3362_v37, %v2590_v51  ;;  %vm248_vm13 = vcmp.gt.f32.partialorder %v3397_v6, 0.0 }
  0xec   :  { %3157 = vpow2.f32 %v278_v0  ;;  %v286_v10 = vmul.f32 1.442695, %v263_v7  ;;  %v3402_v11 = vadd.f32 %v2787_v9, %v3359_v34  ;;  %v221_v12 = vpop.f32.mrb[11].mxu0  ;;  %v3150_v39 = vpop.eup %3149  ;;  %v310_v7 = vsel %vm240_vm5, %v3365_v38, %v2589_v55 }
  0xed   :  { %3159 = vpow2.f32 %v276_v4  ;;  %v284_v13 = vmul.f32 1.442695, %v262_v8  ;;  %v3405_v14 = vadd.f32 %v221_v12, %v3359_v34  ;;  %v3152_v44 = vpop.eup %3151  ;;  %v2592_v62 = vadd.f32 -1.0, %v3150_v39 }
  0xee   :  { %3161 = vpow2.f32 %v286_v10  ;;  %v265_v15 = vmin.f32 %v3402_v11, 0.0  ;;  %v2591_v4 = vadd.f32 -1.0, %v3152_v44  ;;  %vm251_vm15 = vcmp.gt.f32.partialorder %v3402_v11, 0.0 }
  0xef   :  { %3163 = vpow2.f32 %v284_v13  ;;  %v264_v16 = vmin.f32 %v3405_v14, 0.0  ;;  %v2790_v18 = vpop.f32.mrb[12].mxu0  ;;  %v313_v13 = vsel %vm243_vm6, %v3368_v40, %v2592_v62  ;;  %vm250_vm3 = vcmp.gt.f32.partialorder %v3405_v14, 0.0 }
  0xf0   :  { %v290_v24 = vmul.f32 1.442695, %v265_v15  ;;  %v3416_v25 = vadd.f32 %v2790_v18, %v3359_v34  ;;  %v231_v27 = vpop.f32.mrb[13].mxu0  ;;  %v312_v19 = vsel %vm242_vm7, %v3371_v42, %v2591_v4  ;;  %vm710_vm5 = vcmask 1045504  }
  0xf1   :  { %v288_v35 = vmul.f32 1.442695, %v264_v16  ;;  %v3425_v36 = vadd.f32 %v231_v27, %v3359_v34  ;;  %vm1626_vm7 = vcmask 1043456  }
  0xf2   :  { %3165 = vpow2.f32 %v290_v24  ;;  %v267_v41 = vmin.f32 %v3416_v25, 0.0  ;;  %vm253_vm6 = vcmp.gt.f32.partialorder %v3416_v25, 0.0 }
  0xf3   :  { %3167 = vpow2.f32 %v288_v35  ;;  %v266_v45 = vmin.f32 %v3425_v36, 0.0 }
  0xf4   :  { %v3154_v48 = vpop.eup %3153  ;;  %v294_v34 = vmul.f32 1.442695, %v267_v41 }
  0xf5   :  { %v3156_v49 = vpop.eup %3155  ;;  %v2596_v52 = vadd.f32 -1.0, %v3154_v48  ;;  %v292_v53 = vmul.f32 1.442695, %v266_v45 }
  0xf6   :  { %v3158_v54 = vpop.eup %3157  ;;  %v2595_v57 = vadd.f32 -1.0, %v3156_v49  ;;  %3169 = vpow2.f32 %v294_v34 }
  0xf7   :  { %v3160_v58 = vpop.eup %3159  ;;  %v317_v59 = vsel %vm247_vm9, %v3385_v56, %v2596_v52  ;;  %3171 = vpow2.f32 %v292_v53  ;;  %v2594_v8 = vadd.f32 -1.0, %v3158_v54  ;;  %vm252_vm9 = vcmp.gt.f32.partialorder %v3425_v36, 0.0 }
  0xf8   :  { %v3162_v61 = vpop.eup %3161  ;;  %v334_v63 = vrot.slane %v317_v59, 6  ;;  %v3443_v0 = vsel %vm246_vm11, %v3389_v60, %v2595_v57  ;;  %v2593_v9 = vadd.f32 -1.0, %v3160_v58  ;;  %vm811_vm11 = vcmask 130048  }
  0xf9   :  { %v3164_v1 = vpop.eup %3163  ;;  %v333_v5 = vrot.slane %v3443_v0, 6  ;;  %v2598_v56 = vadd.f32 -1.0, %v3162_v61  ;;  %v315_v22 = vsel %vm245_vm8, %v3377_v47, %v2594_v8  ;;  %vm1795_vm8 = vcmask 1042432  }
  0xfa   :  { %v2597_v60 = vadd.f32 -1.0, %v3164_v1  ;;  %v314_v42 = vsel %vm244_vm10, %v3381_v50, %v2593_v9 }
  0xfb   :  { %v319_v10 = vsel %vm249_vm12, %v3394_v2, %v2598_v56  ;;  %v335_v37 = vsel %vm332_vm2, %v333_v5, %v334_v63 }
  0xfc   :  { %v3166_v12 = vpop.eup %3165  ;;  %v338_v15 = vrot.slane %v319_v10, 6  ;;  %v318_v38 = vsel %vm248_vm13, %v3397_v6, %v2597_v60  ;;  %v355_v16 = vmax.f32 %v310_v7, %v335_v37 }
  0xfd   :  { %v3168_v18 = vpop.eup %3167  ;;  %v336_v2 = vrot.slane %v318_v38, 6  ;;  %v2600_v21 = vadd.f32 -1.0, %v3166_v12 }
  0xfe   :  { %v2599_v40 = vadd.f32 -1.0, %v3168_v18  ;;  %2799 = vmatprep.mubr.msk.f32.mxu0 %vm362_vm4, %v355_v16  ;;  %v539_v50 = vrot.slane %v355_v16, 1  ;;  %v711_v45 = vrot.slane %v355_v16, 2 }
  0xff   :  { %v337_v6 = vsel %vm332_vm2, %v334_v63, %v336_v2  ;;  %v321_v24 = vsel %vm251_vm15, %v3402_v11, %v2600_v21  ;;  %v339_v27 = vsel %vm332_vm2, %v336_v2, %v338_v15 }
 0x100   :  { %v3170_v47 = vpop.eup %3169  ;;  %v3479_v28 = vmax.f32 %v311_v3, %v337_v6  ;;  %v342_v30 = vrot.slane %v321_v24, 6  ;;  %v320_v32 = vsel %vm250_vm3, %v3405_v14, %v2599_v40  ;;  %v357_v35 = vmax.f32 %v312_v19, %v339_v27  ;;  %v27_v40 = vld [vmem:[%s3769_s1 + $0x78] sm:$0xff] }
 0x101   :  { %v3172_v39 = vpop.eup %3171  ;;  %v340_v41 = vrot.slane %v320_v32, 6  ;;  %v2602_v44 = vadd.f32 -1.0, %v3170_v47  ;;  %v30_v32 = vld [vmem:[%s3769_s1 + $0x90] sm:$0xff] }
 0x102   :  { %v2601_v48 = vadd.f32 -1.0, %v3172_v39  ;;  %2800 = vmatmul.mubr.msk.f32.vlgmr.msra.gmra.mrb[14].mxu0 %vm362_vm4, %v3479_v28  ;;  %v452_v11 = vrot.slane %v3479_v28, 6  ;;  %v453_v34 = vrot.slane %v357_v35, 6  ;;  %v540_v49 = vrot.slane %v3479_v28, 1  ;;  %v31_v39 = vld [vmem:[%s3769_s1 + $0x98] sm:$0xff] }
 0x103   :  { %v341_v51 = vsel %vm332_vm2, %v338_v15, %v340_v41  ;;  %v343_v14 = vsel %vm332_vm2, %v340_v41, %v342_v30  ;;  %v323_v52 = vsel %vm253_vm6, %v3416_v25, %v2602_v44  ;;  %v624_v53 = vrot.slane %v3479_v28, 7  ;;  %v32_v41 = vld [vmem:[%s3769_s1 + $0xa0] sm:$0xff] }
 0x104   :  { %v358_v54 = vmax.f32 %v313_v13, %v341_v51  ;;  %v3492_v55 = vmax.f32 %v314_v42, %v343_v14  ;;  %v346_v57 = vrot.slane %v323_v52, 6  ;;  %v322_v58 = vsel %vm252_vm9, %v3425_v36, %v2601_v48  ;;  %v28_v42 = vld [vmem:[%s3769_s1 + $0x80] sm:$0xff] }
 0x105   :  { %v344_v59 = vrot.slane %v322_v58, 6  ;;  %v454_v61 = vsel %vm332_vm2, %v452_v11, %v453_v34  ;;  %v541_v62 = vsel %vm538_vm14, %v539_v50, %v540_v49  ;;  %v625_v63 = vrot.slane %v357_v35, 7  ;;  %v33_v50 = vld [vmem:[%s3769_s1 + $0xa8] sm:$0xff]  ;;  %v35_v11 = vld [vmem:[%s3769_s1 + $0xb8] sm:$0xff] }
 0x106   :  { %2810 = vmatprep.mubr.msk.f32.mxu1 %vm362_vm4, %v454_v61  ;;  %v455_v1 = vrot.slane %v358_v54, 6  ;;  %v627_v25 = vrot.slane %v358_v54, 7  ;;  %v712_v3 = vrot.slane %v3479_v28, 2  ;;  %v1456_v4 = vrot.slane %v358_v54, 3 }
 0x107   :  { %v345_v5 = vsel %vm332_vm2, %v342_v30, %v344_v59  ;;  %v347_v56 = vsel %vm332_vm2, %v344_v59, %v346_v57  ;;  %v626_v7 = vsel %vm623_vm1, %v624_v53, %v625_v63  ;;  %v1457_v36 = vrot.slane %v3492_v55, 3  ;;  %v29_v30 = vld [vmem:[%s3769_s1 + $0x88] sm:$0xff] }
 0x108   :  { %v360_v8 = vmax.f32 %v315_v22, %v345_v5  ;;  %v456_v60 = vsel %vm332_vm2, %v453_v34, %v455_v1  ;;  %v628_v9 = vsel %vm623_vm1, %v625_v63, %v627_v25  ;;  %v713_v10 = vsel %vm710_vm5, %v711_v45, %v712_v3  ;;  %v34_v45 = vld [vmem:[%s3769_s1 + $0xb0] sm:$0xff]  ;;  %v36_v34 = vld [vmem:[%s3769_s1 + $0xc0] sm:$0xff] }
 0x109   :  { %2811 = vmatmul.mubr.msk.f32.vlgmr.msra.gmra.mrb[0].mxu1 %vm362_vm4, %v456_v60  ;;  %v3512_v37 = vsel %vm101_vm0, %v1456_v4, %v1457_v36  ;;  %v3515_v12 = vmax.f32 %v3443_v0, %v347_v56  ;;  %v1627_v13 = vrot.slane %v358_v54, 4  ;;  %v1628_v15 = vrot.slane %v3492_v55, 4 }
 0x10a   :  { %3024 = vmatpush3.bf16.msra.mxu1 %v3347_v29  ;;  %2821 = vmatprep.mubr.msk.f32.mxu1 %vm362_vm4, %v541_v62  ;;  %v1542_v38 = vrot.slane %v360_v8, 1  ;;  %v1711_v16 = vrot.slane %v360_v8, 2  ;;  %v1796_v18 = vrot.slane %v358_v54, 5  ;;  %v1797_v19 = vrot.slane %v3492_v55, 5 }
 0x10b   :  { %3026 = vmatprep.subr.bf16.mxu1 %v3428_v43  ;;  %v1543_v2 = vrot.slane %v3515_v12, 1  ;;  %v3526_v0 = vsel %vm1626_vm7, %v1627_v13, %v1628_v15  ;;  %v1712_v21 = vrot.slane %v3515_v12, 2  ;;  %v1799_v22 = vrot.slane %v360_v8, 5 }
 0x10c   :  { %v3536_v6 = vsel %vm1795_vm8, %v1796_v18, %v1797_v19  ;;  %v3553_v28 = vpack.c.bf16 %v28_v42, %v27_v40  ;;  %v3565_v35 = vpack.c.bf16 %v30_v32, %v29_v30  ;;  %v3575_v44 = vpack.c.bf16 %v32_v41, %v31_v39  ;;  %v3644_v42 = vld [vmem:[%s3769_s1 + $0xc8] sm:$0xff]  ;;  %v3650_v30 = vld [vmem:[%s3769_s1 + $0xd0] sm:$0xff]  ;;  %s3224_s1 = smov [#allocation2]  }
 0x10d   :  { %v3541_v24 = vsel %vm538_vm14, %v1542_v38, %v1543_v2  ;;  %v3546_v27 = vsel %vm710_vm5, %v1711_v16, %v1712_v21  ;;  %v3549_v47 = vsel %vm1795_vm8, %v1797_v19, %v1799_v22  ;;  %v3589_v48 = vpack.c.bf16 %v34_v45, %v33_v50  ;;  %s2566_s7 = sshll.u32 %s3224_s1, 4  ;;  %s2567_s7 = int_to_ptr.vmem [resolvable:$true] %s2566_s7 }
 0x10e   :  { %3028 = vmatpush3.bf16.msra.mxu1 %v3428_v43  ;;  %v3599_v51 = vpack.c.bf16 %v36_v34, %v35_v11  ;;  %vm3222_vm0 = vmmov 0   ;;  %v3223_v14 = vmov 0.0   ;;  %v446_v54 = vsub.s32 1, %v3350_v31  ;;  %s3197_s8 = scalar_lea.vmem %s2567_s7, 32  ;;  %p3202_p1 = scmp.lt.s32.totalorder %s2567_s7, %s2567_s7 }
 0x10f   :  { %3030 = vmatprep.subr.bf16.mxu1 %v3432_v46  ;;  %2857 = vmatprep.mubr.msk.f32.mxu0 %vm3222_vm0, %v3223_v14  ;;  %vm1300_vm14 = vcmask 64512   ;;  %vm2547_vm7 = vcmask 25600   ;;  %p3198_p0 = scmp.ne.s32.totalorder %s2567_s7, %s3197_s8  ;;  %p3203_p2 = scmp.lt.s32.totalorder %s3197_s8, %s3197_s8 }
 0x110   :  { %v3611_v57 = vrot.slane %v3356_v33, %v446_v54 }
 0x111   :  { %2822 = vmatmul.mubr.msk.f32.vlgmr.msra.gmra.mrb[0].mxu1 %vm362_vm4, %v540_v49  ;;  %v3221_v49 = vmov 0.0|0.0   ;;  %p3204_p3 = por %p3203_p2, %p3202_p1 }
 0x112   :  { %3032 = vmatpush3.bf16.msra.mxu1 %v3432_v46  ;;  %2832 = vmatprep.mubr.msk.f32.mxu1 %vm362_vm4, %v626_v7 }
 0x113   :  { %3034 = vmatprep.subr.bf16.mxu1 %v3553_v28  ;;  %3048 = vmatprep.subr.bf16.mxu0 %v3221_v49  ;;  %p3205_p4 = pnand %p3204_p3, %p3198_p0 }
 0x114   :  { %3050 = vmatpush3.bf16.msra.mxu0 %v3599_v51 }
 0x115   :  { %3051 = vmatprep.subr.bf16.mxu0 %v3221_v49 }
 0x116   :  { %3036 = vmatpush3.bf16.msra.mxu1 %v3553_v28 }
 0x117   :  { %3038 = vmatprep.subr.bf16.mxu1 %v3565_v35 }
 0x119   :  { %2833 = vmatmul.mubr.msk.f32.vlgmr.msra.gmra.mrb[0].mxu1 %vm362_vm4, %v628_v9 }
 0x11a   :  { %3040 = vmatpush3.bf16.msra.mxu1 %v3565_v35  ;;  %2843 = vmatprep.mubr.msk.f32.mxu1 %vm362_vm4, %v713_v10 }
 0x11b   :  { %3042 = vmatprep.subr.bf16.mxu1 %v3575_v44 }
 0x11e   :  { %3044 = vmatpush3.bf16.msra.mxu1 %v3575_v44 }
 0x11f   :  { %3045 = vmatprep.subr.bf16.mxu1 %v3221_v49 }
 0x121   :  { %2844 = vmatmul.mubr.msk.f32.vlgmr.msra.gmra.mrb[0].mxu1 %vm362_vm4, %v712_v3 }
 0x122   :  { %3047 = vmatpush3.bf16.msra.mxu1 %v3589_v48  ;;  %2850 = vmatprep.mubr.msk.f32.mxu1 %vm3222_vm0, %v3223_v14 }
 0x123   :  { %3057 = vmatprep.subr.bf16.mxu1 %v3221_v49 }
 0x1d5   :  { %v2801_v52 = vpop.f32.mrb[14].mxu0 }
 0x1d6   :  { %v435_v53 = vpop.f32.mrb[15].mxu0  ;;  %v449_v58 = vadd.f32 %v2801_v52, %v3611_v57 }
 0x1d7   :  { %v448_v59 = vadd.f32 %v3611_v57, %v435_v53 }
 0x1f4   :  { %v2845_v61 = vpop.f32.mrb[0].mxu1 }
 0x1f5   :  { %v3122_v62 = vadd.f32 %v2845_v61, %v449_v58  ;;  %v784_v63 = vpop.f32.mrb[1].mxu1 }
 0x1f6   :  { %v3124_v1 = vadd.f32 %v784_v63, %v448_v59 }
 0x1f7   :  { %v798_v25 = vmin.f32 %v3122_v62, 0.0  ;;  %vm796_vm2 = vcmp.gt.f32.partialorder %v3122_v62, 0.0 }
 0x1f8   :  { %v797_v3 = vmin.f32 %v3124_v1, 0.0  ;;  %vm795_vm10 = vcmp.gt.f32.partialorder %v3124_v1, 0.0 }
 0x1f9   :  { %v801_v4 = vmul.f32 1.442695, %v798_v25 }
 0x1fa   :  { %v799_v5 = vmul.f32 1.442695, %v797_v3 }
 0x1fb   :  { %3173 = vpow2.f32 %v801_v4 }
 0x1fc   :  { %3175 = vpow2.f32 %v799_v5 }
 0x205   :  { %v3174_v56 = vpop.eup %3173 }
 0x206   :  { %v3176_v7 = vpop.eup %3175  ;;  %v2614_v31 = vadd.f32 -1.0, %v3174_v56 }
 0x207   :  { %v2613_v8 = vadd.f32 -1.0, %v3176_v7 }
 0x208   :  { %v806_v60 = vsel %vm796_vm2, %v3122_v62, %v2614_v31 }
 0x209   :  { %v805_v9 = vsel %vm795_vm10, %v3124_v1, %v2613_v8  ;;  %v1133_v13 = vrot.slane %v806_v60, 1 }
 0x20a   :  { %v808_v10 = vrot.slane %v805_v9, 1 }
 0x20b   :  { %v1135_v18 = vmax.f32 %v806_v60, %v1133_v13 }
 0x20c   :  { %v810_v38 = vmax.f32 %v805_v9, %v808_v10 }
 0x20d   :  { %v1213_v40 = vrot.slane %v1135_v18, 2 }
 0x20e   :  { %2851 = vmatmul.mubr.msk.f32.vlgmr.msra.gmra.mrb[2].mxu1 %vm811_vm11, %v810_v38  ;;  %v889_v16 = vrot.slane %v810_v38, 2  ;;  %v972_v19 = vrot.slane %v810_v38, 4  ;;  %v1049_v22 = vrot.slane %v810_v38, 6 }
 0x20f   :  { %3059 = vmatpush3.bf16.msra.mxu1 %v3589_v48  ;;  %2878 = vmatprep.mubr.msk.f32.mxu1 %vm3222_vm0, %v3223_v14 }
 0x210   :  { %2858 = vmatmul.mubr.msk.f32.vlgmr.msra.gmra.mrb[16].mxu0 %vm811_vm11, %v889_v16  ;;  %2888 = vmatprep.subr.mxu1 %v3223_v14 }
 0x211   :  { %3053 = vmatpush3.bf16.msra.mxu0 %v3589_v48  ;;  %2864 = vmatprep.mubr.msk.f32.mxu0 %vm3222_vm0, %v3223_v14 }
 0x212   :  { %2879 = vmatmul.mubr.msk.f32.vlgmr.msra.gmra.mrb[4].mxu1 %vm811_vm11, %v1135_v18  ;;  %3054 = vmatprep.subr.bf16.mxu0 %v3221_v49 }
 0x213   :  { %2890 = vmatprep.mubr.msk.f32.mxu1 %vm3222_vm0, %v3223_v14  ;;  %2889 = vmatpush3.msra.mxu1 %v3644_v42 }
 0x214   :  { %2865 = vmatmul.mubr.msk.f32.vlgmr.msra.gmra.mrb[18].mxu0 %vm811_vm11, %v972_v19  ;;  %3064 = vmatprep.subr.bf16.mxu1 %v3307_v17 }
 0x215   :  { %3056 = vmatpush3.bf16.msra.mxu0 %v3599_v51  ;;  %2871 = vmatprep.mubr.msk.f32.mxu0 %vm3222_vm0, %v3223_v14 }
 0x216   :  { %3060 = vmatprep.subr.bf16.mxu0 %v3221_v49 }
 0x218   :  { %2872 = vmatmul.mubr.msk.f32.vlgmr.msra.gmra.mrb[20].mxu0 %vm811_vm11, %v1049_v22 }
 0x219   :  { %3062 = vmatpush3.bf16.msra.mxu0 %v3599_v51  ;;  %2885 = vmatprep.mubr.msk.f32.mxu0 %vm3222_vm0, %v3223_v14 }
 0x21a   :  { %2893 = vmatprep.subr.mxu0 %v3223_v14 }
 0x21c   :  { %2886 = vmatmul.mubr.msk.f32.vlgmr.msra.gmra.mrb[22].mxu0 %vm811_vm11, %v1213_v40 }
 0x21d   :  { %2895 = vmatprep.mubr.msk.f32.mxu0 %vm3222_vm0, %v3223_v14  ;;  %2894 = vmatpush3.msra.mxu0 %v3650_v30 }
 0x21e   :  { %3103 = vmatprep.subr.bf16.mxu0 %v3221_v49 }
 0x2e1   :  { %v881_v32 = vpop.f32.mrb[2].mxu1 }
 0x2e2   :  { %v886_v39 = vrot.slane %v881_v32, 6  ;;  %v2852_v41 = vpop.f32.mrb[3].mxu1 }
 0x2e3   :  { %v958_v50 = vpop.f32.mrb[16].mxu0 }
 0x2e4   :  { %v888_v45 = vadd.f32 %v886_v39, %v3356_v33  ;;  %v963_v11 = vrot.slane %v958_v50, 6  ;;  %v2859_v34 = vpop.f32.mrb[17].mxu0 }
 0x2e5   :  { %v1205_v52 = vpop.f32.mrb[4].mxu1 }
 0x2e6   :  { %v965_v53 = vadd.f32 %v963_v11, %v888_v45  ;;  %v2880_v54 = vpop.f32.mrb[5].mxu1  ;;  %v1210_v25 = vrot.slane %v1205_v52, 6 }
 0x2e7   :  { %v1041_v58 = vpop.f32.mrb[18].mxu0 }
 0x2e8   :  { %v967_v59 = vmin.f32 %v965_v53, 0.0  ;;  %v1046_v61 = vrot.slane %v1041_v58, 6  ;;  %v2866_v62 = vpop.f32.mrb[19].mxu0  ;;  %v1212_v31 = vadd.f32 %v1210_v25, %v3356_v33  ;;  %vm966_vm12 = vcmp.gt.f32.partialorder %v965_v53, 0.0 }
 0x2ea   :  { %v968_v1 = vmul.f32 1.442695, %v967_v59  ;;  %v1048_v3 = vadd.f32 %v1046_v61, %v3356_v33 }
 0x2eb   :  { %v1118_v63 = vpop.f32.mrb[20].mxu0 }
 0x2ec   :  { %v1123_v4 = vrot.slane %v1118_v63, 6  ;;  %v2873_v5 = vpop.f32.mrb[21].mxu0  ;;  %3177 = vpow2.f32 %v968_v1 }
 0x2ee   :  { %v1125_v56 = vadd.f32 %v1123_v4, %v1048_v3 }
 0x2ef   :  { %v1282_v7 = vpop.f32.mrb[22].mxu0 }
 0x2f0   :  { %v1127_v8 = vmin.f32 %v1125_v56, 0.0  ;;  %v1287_v60 = vrot.slane %v1282_v7, 6  ;;  %v2887_v9 = vpop.f32.mrb[23].mxu0  ;;  %vm1126_vm13 = vcmp.gt.f32.partialorder %v1125_v56, 0.0 }
 0x2f2   :  { %v1128_v10 = vmul.f32 1.442695, %v1127_v8  ;;  %v1289_v13 = vadd.f32 %v1287_v60, %v1212_v31 }
 0x2f4   :  { %3179 = vpow2.f32 %v1128_v10  ;;  %v1291_v38 = vmin.f32 %v1289_v13, 0.0  ;;  %vm1290_vm15 = vcmp.gt.f32.partialorder %v1289_v13, 0.0 }
 0x2f6   :  { %v1292_v16 = vmul.f32 1.442695, %v1291_v38  ;;  %v3178_v18 = vpop.eup %3177 }
 0x2f7   :  { %v2617_v19 = vadd.f32 -1.0, %v3178_v18 }
 0x2f8   :  { %3181 = vpow2.f32 %v1292_v16 }
 0x2f9   :  { %v971_v32 = vsel %vm966_vm12, %v965_v53, %v2617_v19 }
 0x2fe   :  { %v3180_v22 = vpop.eup %3179 }
 0x2ff   :  { %v2620_v40 = vadd.f32 -1.0, %v3180_v22 }
 0x301   :  { %v1131_v39 = vsel %vm1126_vm13, %v1125_v56, %v2620_v40 }
 0x302   :  { %v3182_v41 = vpop.eup %3181  ;;  %v1296_v50 = vmax.f32 %v971_v32, %v1131_v39 }
 0x303   :  { %v2623_v45 = vadd.f32 -1.0, %v3182_v41 }
 0x304   :  { %v1299_v11 = vrot.slane %v1296_v50, 2 }
 0x305   :  { %v1295_v34 = vsel %vm1290_vm15, %v1289_v13, %v2623_v45 }
 0x306   :  { %v1297_v52 = vmax.f32 %v1131_v39, %v1295_v34  ;;  %2891 = vmatmul.mubr.msk.f32.vlgmr.msra.gmra.mrb[6].mxu1 %vm1300_vm14, %v1299_v11 }
 0x307   :  { %3066 = vmatpush3.bf16.msra.mxu1 %v3307_v17  ;;  %2906 = vmatprep.mubr.msk.f32.mxu1 %vm362_vm4, %v3512_v37 }
 0x308   :  { %v1378_v54 = vrot.slane %v1297_v52, 2  ;;  %3068 = vmatprep.subr.bf16.mxu1 %v3317_v20 }
 0x30a   :  { %2896 = vmatmul.mubr.msk.f32.vlgmr.msra.gmra.mrb[24].mxu0 %vm1300_vm14, %v1378_v54 }
 0x30b   :  { %3070 = vmatpush3.bf16.msra.mxu1 %v3317_v20  ;;  %3105 = vmatpush3.bf16.msra.mxu0 %v3589_v48 }
 0x30c   :  { %3072 = vmatprep.subr.bf16.mxu1 %v3327_v23  ;;  %2957 = vmatprep.mubr.msk.f32.mxu0 %vm3222_vm0, %v3223_v14 }
 0x30d   :  { %3106 = vmatprep.subr.bf16.mxu0 %v3221_v49 }
 0x30e   :  { %2907 = vmatmul.mubr.msk.f32.vlgmr.msra.gmra.mrb[8].mxu1 %vm362_vm4, %v1457_v36 }
 0x30f   :  { %3074 = vmatpush3.bf16.msra.mxu1 %v3327_v23  ;;  %2917 = vmatprep.mubr.msk.f32.mxu1 %vm362_vm4, %v3541_v24 }
 0x310   :  { %3076 = vmatprep.subr.bf16.mxu1 %v3337_v26 }
 0x313   :  { %3078 = vmatpush3.bf16.msra.mxu1 %v3337_v26 }
 0x314   :  { %3080 = vmatprep.subr.bf16.mxu1 %v3347_v29 }
 0x316   :  { %2918 = vmatmul.mubr.msk.f32.vlgmr.msra.gmra.mrb[8].mxu1 %vm362_vm4, %v1543_v2 }
 0x317   :  { %3082 = vmatpush3.bf16.msra.mxu1 %v3347_v29  ;;  %2928 = vmatprep.mubr.msk.f32.mxu1 %vm362_vm4, %v3526_v0 }
 0x318   :  { %3084 = vmatprep.subr.bf16.mxu1 %v3428_v43 }
 0x31b   :  { %3086 = vmatpush3.bf16.msra.mxu1 %v3428_v43 }
 0x31c   :  { %3088 = vmatprep.subr.bf16.mxu1 %v3432_v46 }
 0x31e   :  { %2929 = vmatmul.mubr.msk.f32.vlgmr.msra.gmra.mrb[8].mxu1 %vm362_vm4, %v1628_v15 }
 0x31f   :  { %3090 = vmatpush3.bf16.msra.mxu1 %v3432_v46  ;;  %2939 = vmatprep.mubr.msk.f32.mxu1 %vm362_vm4, %v3546_v27 }
 0x320   :  { %3092 = vmatprep.subr.bf16.mxu1 %v3553_v28 }
 0x323   :  { %3094 = vmatpush3.bf16.msra.mxu1 %v3553_v28 }
 0x324   :  { %3096 = vmatprep.subr.bf16.mxu1 %v3565_v35 }
 0x326   :  { %2940 = vmatmul.mubr.msk.f32.vlgmr.msra.gmra.mrb[8].mxu1 %vm362_vm4, %v1712_v21 }
 0x327   :  { %3098 = vmatpush3.bf16.msra.mxu1 %v3565_v35  ;;  %2950 = vmatprep.mubr.msk.f32.mxu1 %vm362_vm4, %v3536_v6 }
 0x328   :  { %3100 = vmatprep.subr.bf16.mxu1 %v3575_v44 }
 0x32b   :  { %3102 = vmatpush3.bf16.msra.mxu1 %v3575_v44 }
 0x32e   :  { %2951 = vmatmul.mubr.msk.f32.vlgmr.msra.gmra.mrb[8].mxu1 %vm362_vm4, %v3549_v47 }
 0x3d9   :  { %v1369_v17 = vpop.f32.mrb[6].mxu1 }
 0x3da   :  { %v1374_v20 = vrot.slane %v1369_v17, 5  ;;  %v2892_v23 = vpop.f32.mrb[7].mxu1 }
 0x3dc   :  { %v1376_v29 = vadd.f32 %v1374_v20, %v3356_v33 }
 0x3dd   :  { %v1447_v26 = vpop.f32.mrb[24].mxu0 }
 0x3de   :  { %v1452_v43 = vrot.slane %v1447_v26, 5  ;;  %v2897_v46 = vpop.f32.mrb[25].mxu0 }
 0x3e0   :  { %v3708_v55 = vadd.f32 %v1452_v43, %v1376_v29 }
 0x401   :  { %v2952_v36 = vpop.f32.mrb[8].mxu1 }
 0x402   :  { %v1871_v37 = vpop.f32.mrb[9].mxu1  ;;  %v3125_v15 = vadd.f32 %v2952_v36, %v3611_v57 }
 0x403   :  { %v3126_v12 = vadd.f32 %v1871_v37, %v3611_v57 }
 0x404   :  { %v1885_v21 = vmin.f32 %v3125_v15, 0.0  ;;  %vm1883_vm3 = vcmp.gt.f32.partialorder %v3125_v15, 0.0 }
 0x405   :  { %v1884_v2 = vmin.f32 %v3126_v12, 0.0  ;;  %vm1882_vm4 = vcmp.gt.f32.partialorder %v3126_v12, 0.0 }
 0x406   :  { %v1888_v6 = vmul.f32 1.442695, %v1885_v21 }
 0x407   :  { %v1886_v0 = vmul.f32 1.442695, %v1884_v2 }
 0x409   :  { %3183 = vpow2.f32 %v1886_v0 }
 0x40a   :  { %3185 = vpow2.f32 %v1888_v6 }
 0x413   :  { %v3184_v24 = vpop.eup %3183 }
 0x414   :  { %v2636_v27 = vadd.f32 -1.0, %v3184_v24  ;;  %v3186_v44 = vpop.eup %3185 }
 0x415   :  { %v2637_v53 = vadd.f32 -1.0, %v3186_v44 }
 0x416   :  { %v1892_v47 = vsel %vm1882_vm4, %v3126_v12, %v2636_v27 }
 0x417   :  { %v1895_v28 = vrot.slane %v1892_v47, 1  ;;  %v1893_v59 = vsel %vm1883_vm3, %v3125_v15, %v2637_v53 }
 0x418   :  { %v2219_v61 = vrot.slane %v1893_v59, 1 }
 0x419   :  { %v1897_v35 = vmax.f32 %v1892_v47, %v1895_v28 }
 0x41a   :  { %v2221_v63 = vmax.f32 %v1893_v59, %v2219_v61 }
 0x41b   :  { %2958 = vmatmul.mubr.msk.f32.vlgmr.msra.gmra.mrb[26].mxu0 %vm811_vm11, %v1897_v35  ;;  %v1975_v57 = vrot.slane %v1897_v35, 2  ;;  %v2058_v58 = vrot.slane %v1897_v35, 4  ;;  %v2135_v62 = vrot.slane %v1897_v35, 6 }
 0x41c   :  { %3108 = vmatpush3.bf16.msra.mxu0 %v3599_v51  ;;  %2964 = vmatprep.mubr.msk.f32.mxu0 %vm3222_vm0, %v3223_v14  ;;  %v2299_v1 = vrot.slane %v2221_v63, 2 }
 0x41d   :  { %3109 = vmatprep.subr.bf16.mxu0 %v3221_v49 }
 0x41f   :  { %2965 = vmatmul.mubr.msk.f32.vlgmr.msra.gmra.mrb[28].mxu0 %vm811_vm11, %v1975_v57 }
 0x420   :  { %3111 = vmatpush3.bf16.msra.mxu0 %v3589_v48  ;;  %2971 = vmatprep.mubr.msk.f32.mxu0 %vm3222_vm0, %v3223_v14 }
 0x421   :  { %3112 = vmatprep.subr.bf16.mxu0 %v3221_v49 }
 0x423   :  { %2972 = vmatmul.mubr.msk.f32.vlgmr.msra.gmra.mrb[30].mxu0 %vm811_vm11, %v2058_v58 }
 0x424   :  { %3114 = vmatpush3.bf16.msra.mxu0 %v3599_v51  ;;  %2978 = vmatprep.mubr.msk.f32.mxu0 %vm3222_vm0, %v3223_v14 }
 0x425   :  { %3115 = vmatprep.subr.bf16.mxu0 %v3221_v49 }
 0x427   :  { %2979 = vmatmul.mubr.msk.f32.vlgmr.msra.gmra.mrb[32].mxu0 %vm811_vm11, %v2135_v62 }
 0x428   :  { %3117 = vmatpush3.bf16.msra.mxu0 %v3589_v48  ;;  %2985 = vmatprep.mubr.msk.f32.mxu0 %vm3222_vm0, %v3223_v14 }
 0x429   :  { %3118 = vmatprep.subr.bf16.mxu0 %v3221_v49 }
 0x42b   :  { %2986 = vmatmul.mubr.msk.f32.vlgmr.msra.gmra.mrb[34].mxu0 %vm811_vm11, %v2221_v63 }
 0x42c   :  { %3120 = vmatpush3.bf16.msra.mxu0 %v3599_v51  ;;  %2992 = vmatprep.mubr.msk.f32.mxu0 %vm3222_vm0, %v3223_v14 }
 0x42d   :  { %2995 = vmatprep.subr.mxu0 %v3223_v14 }
 0x42f   :  { %2993 = vmatmul.mubr.msk.f32.vlgmr.msra.gmra.mrb[36].mxu0 %vm811_vm11, %v2299_v1 }
 0x430   :  { %2996 = vmatpush3.msra.mxu0 %v3644_v42  ;;  %2997 = vmatprep.mubr.msk.f32.mxu0 %vm3222_vm0, %v3223_v14 }
 0x431   :  { %3000 = vmatprep.subr.mxu0 %v3223_v14 }
 0x4ee   :  { %v1967_v48 = vpop.f32.mrb[26].mxu0 }
 0x4ef   :  { %v1972_v49 = vrot.slane %v1967_v48, 6  ;;  %v2959_v25 = vpop.f32.mrb[27].mxu0 }
 0x4f1   :  { %v1974_v51 = vadd.f32 %v1972_v49, %v3356_v33 }
 0x4f2   :  { %v2044_v3 = vpop.f32.mrb[28].mxu0 }
 0x4f3   :  { %v2049_v4 = vrot.slane %v2044_v3, 6  ;;  %v2966_v5 = vpop.f32.mrb[29].mxu0 }
 0x4f5   :  { %v2051_v56 = vadd.f32 %v2049_v4, %v1974_v51 }
 0x4f6   :  { %v2127_v7 = vpop.f32.mrb[30].mxu0 }
 0x4f7   :  { %v2053_v31 = vmin.f32 %v2051_v56, 0.0  ;;  %v2132_v8 = vrot.slane %v2127_v7, 6  ;;  %v2973_v60 = vpop.f32.mrb[31].mxu0  ;;  %vm2052_vm5 = vcmp.gt.f32.partialorder %v2051_v56, 0.0 }
 0x4f9   :  { %v2054_v42 = vmul.f32 1.442695, %v2053_v31  ;;  %v2134_v10 = vadd.f32 %v2132_v8, %v3356_v33 }
 0x4fa   :  { %v2204_v9 = vpop.f32.mrb[32].mxu0 }
 0x4fb   :  { %v2209_v13 = vrot.slane %v2204_v9, 6  ;;  %v2980_v38 = vpop.f32.mrb[33].mxu0  ;;  %3187 = vpow2.f32 %v2054_v42 }
 0x4fd   :  { %v2211_v16 = vadd.f32 %v2209_v13, %v2134_v10 }
 0x4fe   :  { %v2291_v18 = vpop.f32.mrb[34].mxu0 }
 0x4ff   :  { %v2213_v19 = vmin.f32 %v2211_v16, 0.0  ;;  %v2296_v22 = vrot.slane %v2291_v18, 6  ;;  %v2987_v40 = vpop.f32.mrb[35].mxu0  ;;  %vm2212_vm6 = vcmp.gt.f32.partialorder %v2211_v16, 0.0 }
 0x501   :  { %v2214_v32 = vmul.f32 1.442695, %v2213_v19  ;;  %v2298_v41 = vadd.f32 %v2296_v22, %v3356_v33 }
 0x502   :  { %v2368_v39 = vpop.f32.mrb[36].mxu0 }
 0x503   :  { %3189 = vpow2.f32 %v2214_v32  ;;  %v2373_v50 = vrot.slane %v2368_v39, 6  ;;  %v2994_v45 = vpop.f32.mrb[37].mxu0 }
 0x505   :  { %v2375_v11 = vadd.f32 %v2373_v50, %v2298_v41  ;;  %v3188_v52 = vpop.eup %3187 }
 0x506   :  { %v2640_v17 = vadd.f32 -1.0, %v3188_v52 }
 0x507   :  { %v2377_v34 = vmin.f32 %v2375_v11, 0.0  ;;  %vm2376_vm9 = vcmp.gt.f32.partialorder %v2375_v11, 0.0 }
 0x508   :  { %v2057_v26 = vsel %vm2052_vm5, %v2051_v56, %v2640_v17 }
 0x509   :  { %v2378_v54 = vmul.f32 1.442695, %v2377_v34 }
 0x50b   :  { %3191 = vpow2.f32 %v2378_v54 }
 0x50d   :  { %v3190_v20 = vpop.eup %3189 }
 0x50e   :  { %v2643_v23 = vadd.f32 -1.0, %v3190_v20 }
 0x510   :  { %v2217_v29 = vsel %vm2212_vm6, %v2211_v16, %v2643_v23 }
 0x511   :  { %v2382_v43 = vmax.f32 %v2057_v26, %v2217_v29 }
 0x513   :  { %v2385_v46 = vrot.slane %v2382_v43, 2 }
 0x515   :  { %v3192_v36 = vpop.eup %3191  ;;  %2998 = vmatmul.mubr.msk.f32.vlgmr.msra.gmra.mrb[38].mxu0 %vm1300_vm14, %v2385_v46 }
 0x516   :  { %v2646_v37 = vadd.f32 -1.0, %v3192_v36  ;;  %3001 = vmatpush3.msra.mxu0 %v3650_v30  ;;  %3002 = vmatprep.mubr.msk.f32.mxu0 %vm3222_vm0, %v3223_v14  ;;  %v2541_v30 = vrot.slane %v3708_v55, 3 }
 0x518   :  { %v2381_v12 = vsel %vm2376_vm9, %v2375_v11, %v2646_v37 }
 0x519   :  { %v2383_v15 = vmax.f32 %v2217_v29, %v2381_v12 }
 0x51b   :  { %v2463_v2 = vrot.slane %v2383_v15, 2 }
 0x51d   :  { %3003 = vmatmul.mubr.msk.f32.vlgmr.msra.gmra.mrb[40].mxu0 %vm1300_vm14, %v2463_v2 }
 0x5e8   :  { %v2454_v0 = vpop.f32.mrb[38].mxu0 }
 0x5e9   :  { %v2999_v21 = vpop.f32.mrb[39].mxu0  ;;  %v2459_v6 = vrot.slane %v2454_v0, 5 }
 0x5eb   :  { %v2461_v27 = vadd.f32 %v2459_v6, %v3356_v33 }
 0x5f0   :  { %v2532_v24 = vpop.f32.mrb[40].mxu0 }
 0x5f1   :  { %v2537_v47 = vrot.slane %v2532_v24, 5  ;;  %v3004_v28 = vpop.f32.mrb[41].mxu0 }
 0x5f3   :  { %v2539_v35 = vadd.f32 %v2537_v47, %v2461_v27 }
 0x5f5   :  { %v2544_v44 = vrot.slane %v2539_v35, 2 }
 0x5f7   :  { %v2546_v14 = vsel %vm623_vm1, %v2541_v30, %v2544_v44 }
 0x5f8   :  { %v2548_v57 = vsel %vm2547_vm7, %v2546_v14, -inf }
 0x5f9   :  { %2549 = vmax.xlane.f32.xlu0 %v2548_v57 }
 0x686   :  { %v2550_v53 = vpop.xlane.xlu0 %2549 }
 0x687   :  { %v2551_v58 = vsub.f32 %v2546_v14, %v2550_v53 }
 0x689   :  { %v2552_v59 = vmul.f32 1.442695, %v2551_v58 }
 0x68b   :  { %3193 = vpow2.f32 %v2552_v59 }
 0x695   :  { %v3194_v61 = vpop.eup %3193 }
 0x696   :  { %v2554_v62 = vsel %vm2547_vm7, %v3194_v61, 0.0 }
 0x697   :  { %2555 = vadd.xlane.f32.xlu0 %v2554_v62 }
 0x724   :  { %v2556_v33 = vpop.xlane.xlu0 %2555 }
 0x725   :  { %3195 = vrcp.f32 %v2556_v33 }
 0x72f   :  { %v3196_v55 = vpop.eup %3195 }
 0x730   :  { %v2558_v63 = vmul.f32 %v3196_v55, %v3194_v61 }
 0x732   :  { %2559 = vst.msk [vmem:[#allocation2] sm:$0x3] %vm2547_vm7, %v2558_v63 }
 0x733   :  { %3208 = shalt.err (!%p3205_p4)
}
 0x734   :  { %s3209_s11 = scalar_lea.hbm %s3770_s2, 32 }
 0x735   :  { %p3210_p5 = scmp.ne.s32.totalorder %s3770_s2, %s3209_s11  ;;  %p3213_p6 = scmp.lt.u32.totalorder %s3209_s11, %s3770_s2 }
 0x737   :  { %p3215_p7 = pnand %p3213_p6, %p3210_p5 }
 0x739   :  { %3218 = shalt.err (!%p3215_p7)
}
 0x73a   :  { %2569 = dma.vmem_to_hbm [thread:$0]  %s2567_s7, 32, %s3770_s2, [#allocation3]  }
 0x73b   :  { %3219 = dma.done.wait [#allocation3], 32  }
 0x73c   :  { %3220 = vsyncadd [#allocation3], 4294967264 }
 0x73d   :  { %2573 = vsyncpa [#allocation3], 1 }

</bundles_post_ra>
